<compile_context>
chip_gen: v7x
topology: tpu7x:2x2x1
jax: 0.10.0
libtpu: 0.0.40
codegen_flags: <defaults>
</compile_context>

<pallas_src>
import math

import jax
import jax.numpy as jnp
from jax.experimental import pallas as pl
from jax.experimental.pallas import tpu as pltpu


def _mlp_kernel(grid_ref, slab_ref, w2_ref, w3_ref, gmat_ref, smat_ref, out_ref):
    # grid_ref block: (1, 2, TBK) -> coordinates for TB samples, coord-major.
    x = grid_ref[0]                      # (2, TBK)
    xh = x[0:1, :]                       # (1, TBK)
    xw = x[1:2, :]                       # (1, TBK)

    # Packed small parameters: columns [w1_h, w1_w, b1, b2, b3, w4, b4].
    slab = slab_ref[...]                 # (F, 7)
    w1h = slab[:, 0:1]                   # (F, 1)  (1/side folded in by wrapper)
    w1w = slab[:, 1:2]
    b1 = slab[:, 2:3]
    b2 = slab[:, 3:4]
    b3 = slab[:, 4:5]
    w4 = slab[:, 5:6]
    b4 = slab[0:1, 6:7]                  # (1, 1)

    # Layer 1 on the VPU: a depth-2 contraction does not deserve an MXU pass.
    h = w1h * xh + w1w * xw + b1         # (F, TBK)
    h = jnp.maximum(h, 0.0)

    # Layers 2 & 3 on the MXU: (F, F) @ (F, TBK), f32 accumulation.
    h = jnp.dot(w2_ref[...], h, preferred_element_type=jnp.float32) + b2
    h = jnp.maximum(h, 0.0)
    h = jnp.dot(w3_ref[...], h, preferred_element_type=jnp.float32) + b3
    h = jnp.maximum(h, 0.0)

    # Layer 4 on VPU + sublane reduction (width-1 MXU pass avoided).
    w = jnp.sum(h * w4, axis=0, keepdims=True) + b4      # (1, TBK)

    # Per-sample normalization via factored segment-ones matrices:
    #   per_sample[s] = sum of w over the K lanes of sample s
    #   denom        = per_sample broadcast back to each of its K lanes
    per_sample = jnp.dot(w, gmat_ref[...],
                         preferred_element_type=jnp.float32)          # (1, TB)
    denom = jnp.dot(per_sample, smat_ref[...],
                    preferred_element_type=jnp.float32)               # (1, TBK)
    out_ref[...] = w / denom


def _choose_tb(N, K):
    """Samples per grid step."""
    total = N * K
    if total <= 2048:
        tb = N                            # single grid step: fewest fixed costs
    else:
        tb = max(1, 1024 // max(K, 1))    # ~1024 rows per step; multiple steps
                                          # shard across TCs via "parallel".
    # Round tb up so TBK = tb*K is a multiple of 128 (unmasked lane-dense
    # stores) whenever the resulting step stays small.
    g = 128 // math.gcd(128, K)
    tb_rounded = ((tb + g - 1) // g) * g
    if tb_rounded * K <= 4096:
        tb = tb_rounded
    return max(1, tb)


def kernel_forward(grid, params, kernel_size_max=20, block_batch=None):
    """grid: (N, K, 2) float32 -> (N, K) float32."""
    N, K, _ = grid.shape
    w1, b1, w2, b2, w3, b3, w4, b4 = params
    F = w1.shape[1]
    side = float(kernel_size_max // 2)

    tb = block_batch if block_batch is not None else _choose_tb(N, K)
    tb = max(1, min(tb, max(N, tb)))

    # Pad N up to a multiple of tb (edge replication; padded rows sliced off).
    G = -(-N // tb)
    N_pad = G * tb
    if N_pad != N:
        pad_rows = jnp.broadcast_to(grid[-1:], (N_pad - N, K, 2))
        grid = jnp.concatenate([grid, pad_rows], axis=0)
    TBK = tb * K

    # Host-side layout plumbing: coordinate-major, lane-dense slabs.
    grid_t = grid.reshape(G, TBK, 2).transpose(0, 2, 1)          # (G, 2, TBK)

    # Pack the small parameters into one (F, 7) slab (one DMA instead of six).
    w1t = jnp.transpose(w1) * (1.0 / side)                       # (F, 2)
    slab = jnp.concatenate(
        [
            w1t,
            jnp.reshape(b1, (F, 1)),
            jnp.reshape(b2, (F, 1)),
            jnp.reshape(b3, (F, 1)),
            jnp.reshape(w4, (F, 1)),
            jnp.broadcast_to(jnp.reshape(b4, (1, 1)), (F, 1)),
        ],
        axis=1,
    ).astype(jnp.float32)                                        # (F, 7)
    w2t = jnp.transpose(w2)                                      # (F, F)
    w3t = jnp.transpose(w3)                                      # (F, F)

    # Factored segment matrices (replace the dense TBK x TBK ones matrix).
    seg = jnp.arange(TBK, dtype=jnp.int32) // K                  # (TBK,)
    sid = jnp.arange(tb, dtype=jnp.int32)                        # (TB,)
    gmat = (seg[:, None] == sid[None, :]).astype(jnp.float32)    # (TBK, TB)
    smat = (sid[:, None] == seg[None, :]).astype(jnp.float32)    # (TB, TBK)

    def full(shape):
        return pl.BlockSpec(shape, lambda i: tuple(0 for _ in shape))

    out = pl.pallas_call(
        _mlp_kernel,
        out_shape=jax.ShapeDtypeStruct((G, TBK), jnp.float32),
        grid_spec=pltpu.PrefetchScalarGridSpec(
            num_scalar_prefetch=0,
            grid=(G,),
            in_specs=[
                pl.BlockSpec((1, 2, TBK), lambda i: (i, 0, 0)),  # coordinates
                full((F, 7)),                                    # packed params
                full((F, F)),                                    # layer-2 weight
                full((F, F)),                                    # layer-3 weight
                full((TBK, tb)),                                 # segment gather
                full((tb, TBK)),                                 # segment scatter
            ],
            out_specs=pl.BlockSpec((1, TBK), lambda i: (i, 0)),  # lane-dense
        ),
        compiler_params=pltpu.CompilerParams(
            dimension_semantics=("parallel",)),
    )(grid_t, slab, w2t, w3t, gmat, smat)

    return out.reshape(N_pad, K)[:N]


def init_params(key, n_feats=128):
    """Mirror nn.Linear weight.data.normal_(0.02) (mean=0.02, std=1), bias=0.
    Weights stored as (in_features, out_features) for x @ W."""
    ks = jax.random.split(key, 4)
    w1 = 0.02 + jax.random.normal(ks[0], (2, n_feats), jnp.float32)
    w2 = 0.02 + jax.random.normal(ks[1], (n_feats, n_feats), jnp.float32)
    w3 = 0.02 + jax.random.normal(ks[2], (n_feats, n_feats), jnp.float32)
    w4 = 0.02 + jax.random.normal(ks[3], (n_feats, 1), jnp.float32)
    b1 = jnp.zeros((1, n_feats), jnp.float32)
    b2 = jnp.zeros((1, n_feats), jnp.float32)
    b3 = jnp.zeros((1, n_feats), jnp.float32)
    b4 = jnp.zeros((1, 1), jnp.float32)
    return (w1, b1, w2, b2, w3, b3, w4, b4)


def reference_forward(grid, params, kernel_size_max=20):
    w1, b1, w2, b2, w3, b3, w4, b4 = params
    n, k, _ = grid.shape
    side = kernel_size_max // 2
    x = grid.reshape(-1, 2) / side
    h = jnp.maximum(x @ w1 + b1, 0.0)
    h = jnp.maximum(h @ w2 + b2, 0.0)
    h = jnp.maximum(h @ w3 + b3, 0.0)
    w = (h @ w4 + b4).reshape(n, k)
    return w / jnp.sum(w, axis=-1, keepdims=True)


if __name__ == "__main__":
    key = jax.random.PRNGKey(0)
    kp, kg = jax.random.split(key)

    KERNEL_SIZE_MAX = 20
    N_FEATS = 128         # module default hidden width
    N, K = 16, 16         # 16 samples, k^2 = 16 points each
                          # -> tb=16, TBK=256, single grid step

    params = init_params(kp, n_feats=N_FEATS)
    grid = jax.random.uniform(kg, (N, K, 2), jnp.float32,
                              minval=-10.0, maxval=10.0)

    out = kernel_forward(grid, params, kernel_size_max=KERNEL_SIZE_MAX)
    out = jax.block_until_ready(out)

    ref = reference_forward(grid, params, kernel_size_max=KERNEL_SIZE_MAX)
    assert out.shape == (N, K)
    max_err = float(jnp.max(jnp.abs(out - ref)))
    assert jnp.allclose(out, ref, atol=2e-5, rtol=2e-5), max_err

    # Exercise the non-divisible-N path (padded up to TBK=128, then sliced).
    N2, K2 = 7, 16
    grid2 = jax.random.uniform(jax.random.PRNGKey(1), (N2, K2, 2), jnp.float32,
                               minval=-10.0, maxval=10.0)
    out2 = jax.block_until_ready(
        kernel_forward(grid2, params, kernel_size_max=KERNEL_SIZE_MAX))
    ref2 = reference_forward(grid2, params, kernel_size_max=KERNEL_SIZE_MAX)
    assert out2.shape == (N2, K2)
    max_err2 = float(jnp.max(jnp.abs(out2 - ref2)))
    assert jnp.allclose(out2, ref2, atol=2e-5, rtol=2e-5), max_err2

    print("KERNEL_OK")
</pallas_src>

<mosaic_0001>
module attributes {stable_mosaic.version = 11 : i64} {
  func.func @_mlp_kernel(%arg0: i32, %arg1: memref<1x2x256xf32, #tpu.memory_space<vmem>>, %arg2: memref<128x7xf32, #tpu.memory_space<vmem>>, %arg3: memref<128x128xf32, #tpu.memory_space<vmem>>, %arg4: memref<128x128xf32, #tpu.memory_space<vmem>>, %arg5: memref<256x16xf32, #tpu.memory_space<vmem>>, %arg6: memref<16x256xf32, #tpu.memory_space<vmem>>, %arg7: memref<1x256xf32, #tpu.memory_space<vmem>>) attributes {dimension_semantics = [#tpu.dimension_semantics<parallel>], iteration_bounds = array<i64: 1>, scalar_prefetch = 0 : i64, scratch_operands = 0 : i64, tpu.core_type = #tpu.core_type<tc>, window_params = [{transform_indices = @transform_0, window_bounds = array<i64: 1, 2, 256>}, {pipeline_mode = #tpu.pipeline_mode<synchronous>, transform_indices = @transform_1, window_bounds = array<i64: 128, 7>}, {pipeline_mode = #tpu.pipeline_mode<synchronous>, transform_indices = @transform_2, window_bounds = array<i64: 128, 128>}, {pipeline_mode = #tpu.pipeline_mode<synchronous>, transform_indices = @transform_3, window_bounds = array<i64: 128, 128>}, {pipeline_mode = #tpu.pipeline_mode<synchronous>, transform_indices = @transform_4, window_bounds = array<i64: 256, 16>}, {pipeline_mode = #tpu.pipeline_mode<synchronous>, transform_indices = @transform_5, window_bounds = array<i64: 16, 256>}, {transform_indices = @transform_6, window_bounds = array<i64: 1, 256>}]} {
    %c0 = arith.constant 0 : index
    %c0_0 = arith.constant 0 : index
    %c0_1 = arith.constant 0 : index
    %0 = vector.load %arg1[%c0, %c0_0, %c0_1] : memref<1x2x256xf32, #tpu.memory_space<vmem>>, vector<1x2x256xf32>
    %1 = vector.shape_cast %0 : vector<1x2x256xf32> to vector<2x256xf32>
    %2 = vector.extract_strided_slice %1 {offsets = [0, 0], sizes = [1, 256], strides = [1, 1]} : vector<2x256xf32> to vector<1x256xf32>
    %3 = vector.extract_strided_slice %1 {offsets = [1, 0], sizes = [1, 256], strides = [1, 1]} : vector<2x256xf32> to vector<1x256xf32>
    %c0_2 = arith.constant 0 : index
    %c0_3 = arith.constant 0 : index
    %4 = vector.load %arg2[%c0_2, %c0_3] : memref<128x7xf32, #tpu.memory_space<vmem>>, vector<128x7xf32>
    %5 = vector.extract_strided_slice %4 {offsets = [0, 0], sizes = [128, 1], strides = [1, 1]} : vector<128x7xf32> to vector<128x1xf32>
    %6 = vector.extract_strided_slice %4 {offsets = [0, 1], sizes = [128, 1], strides = [1, 1]} : vector<128x7xf32> to vector<128x1xf32>
    %7 = vector.extract_strided_slice %4 {offsets = [0, 2], sizes = [128, 1], strides = [1, 1]} : vector<128x7xf32> to vector<128x1xf32>
    %8 = vector.extract_strided_slice %4 {offsets = [0, 3], sizes = [128, 1], strides = [1, 1]} : vector<128x7xf32> to vector<128x1xf32>
    %9 = vector.extract_strided_slice %4 {offsets = [0, 4], sizes = [128, 1], strides = [1, 1]} : vector<128x7xf32> to vector<128x1xf32>
    %10 = vector.extract_strided_slice %4 {offsets = [0, 5], sizes = [128, 1], strides = [1, 1]} : vector<128x7xf32> to vector<128x1xf32>
    %11 = vector.extract_strided_slice %4 {offsets = [0, 6], sizes = [1, 1], strides = [1, 1]} : vector<128x7xf32> to vector<1x1xf32>
    %12 = vector.broadcast %5 : vector<128x1xf32> to vector<128x256xf32>
    %13 = vector.broadcast %2 : vector<1x256xf32> to vector<128x256xf32>
    %14 = arith.mulf %12, %13 : vector<128x256xf32>
    %15 = vector.broadcast %6 : vector<128x1xf32> to vector<128x256xf32>
    %16 = vector.broadcast %3 : vector<1x256xf32> to vector<128x256xf32>
    %17 = arith.mulf %15, %16 : vector<128x256xf32>
    %18 = arith.addf %14, %17 : vector<128x256xf32>
    %19 = vector.broadcast %7 : vector<128x1xf32> to vector<128x256xf32>
    %20 = arith.addf %18, %19 : vector<128x256xf32>
    %cst = arith.constant 0.000000e+00 : f32
    %21 = vector.broadcast %cst : f32 to vector<128x256xf32>
    %22 = arith.maximumf %20, %21 : vector<128x256xf32>
    %c0_4 = arith.constant 0 : index
    %c0_5 = arith.constant 0 : index
    %23 = vector.load %arg3[%c0_4, %c0_5] : memref<128x128xf32, #tpu.memory_space<vmem>>, vector<128x128xf32>
    %cst_6 = arith.constant dense<0.000000e+00> : vector<128x256xf32>
    %24 = tpu.matmul %23, %22, %cst_6 {dimension_numbers = #tpu.dot_dimension_numbers<[1], [0], [0], [1], [0, 0, 1, 1], [], []>} : vector<128x128xf32>, vector<128x256xf32>, vector<128x256xf32> -> vector<128x256xf32>
    %25 = vector.broadcast %8 : vector<128x1xf32> to vector<128x256xf32>
    %26 = arith.addf %24, %25 : vector<128x256xf32>
    %cst_7 = arith.constant 0.000000e+00 : f32
    %27 = vector.broadcast %cst_7 : f32 to vector<128x256xf32>
    %28 = arith.maximumf %26, %27 : vector<128x256xf32>
    %c0_8 = arith.constant 0 : index
    %c0_9 = arith.constant 0 : index
    %29 = vector.load %arg4[%c0_8, %c0_9] : memref<128x128xf32, #tpu.memory_space<vmem>>, vector<128x128xf32>
    %cst_10 = arith.constant dense<0.000000e+00> : vector<128x256xf32>
    %30 = tpu.matmul %29, %28, %cst_10 {dimension_numbers = #tpu.dot_dimension_numbers<[1], [0], [0], [1], [0, 0, 1, 1], [], []>} : vector<128x128xf32>, vector<128x256xf32>, vector<128x256xf32> -> vector<128x256xf32>
    %31 = vector.broadcast %9 : vector<128x1xf32> to vector<128x256xf32>
    %32 = arith.addf %30, %31 : vector<128x256xf32>
    %cst_11 = arith.constant 0.000000e+00 : f32
    %33 = vector.broadcast %cst_11 : f32 to vector<128x256xf32>
    %34 = arith.maximumf %32, %33 : vector<128x256xf32>
    %35 = vector.broadcast %10 : vector<128x1xf32> to vector<128x256xf32>
    %36 = arith.mulf %34, %35 : vector<128x256xf32>
    %cst_12 = arith.constant dense<0.000000e+00> : vector<256xf32>
    %37 = vector.multi_reduction <add>, %36, %cst_12 [0] : vector<128x256xf32> to vector<256xf32>
    %38 = vector.shape_cast %37 : vector<256xf32> to vector<1x256xf32>
    %39 = vector.broadcast %11 : vector<1x1xf32> to vector<1x256xf32>
    %40 = arith.addf %38, %39 : vector<1x256xf32>
    %c0_13 = arith.constant 0 : index
    %c0_14 = arith.constant 0 : index
    %41 = vector.load %arg5[%c0_13, %c0_14] : memref<256x16xf32, #tpu.memory_space<vmem>>, vector<256x16xf32>
    %cst_15 = arith.constant dense<0.000000e+00> : vector<1x16xf32>
    %42 = tpu.matmul %40, %41, %cst_15 {dimension_numbers = #tpu.dot_dimension_numbers<[1], [0], [0], [1], [0, 0, 1, 1], [], []>} : vector<1x256xf32>, vector<256x16xf32>, vector<1x16xf32> -> vector<1x16xf32>
    %c0_16 = arith.constant 0 : index
    %c0_17 = arith.constant 0 : index
    %43 = vector.load %arg6[%c0_16, %c0_17] : memref<16x256xf32, #tpu.memory_space<vmem>>, vector<16x256xf32>
    %cst_18 = arith.constant dense<0.000000e+00> : vector<1x256xf32>
    %44 = tpu.matmul %42, %43, %cst_18 {dimension_numbers = #tpu.dot_dimension_numbers<[1], [0], [0], [1], [0, 0, 1, 1], [], []>} : vector<1x16xf32>, vector<16x256xf32>, vector<1x256xf32> -> vector<1x256xf32>
    %45 = arith.divf %40, %44 : vector<1x256xf32>
    %c0_19 = arith.constant 0 : index
    %c0_20 = arith.constant 0 : index
    %46 = vector.load %arg7[%c0_19, %c0_20] : memref<1x256xf32, #tpu.memory_space<vmem>>, vector<1x256xf32>
    tpu.vector_store %arg7[%c0_19, %c0_20], %45 {strides = array<i32>} : memref<1x256xf32, #tpu.memory_space<vmem>>, vector<1x256xf32>,
    return
  }
  func.func @transform_0(%arg0: i32) -> (i32, i32, i32) {
    %c0_i32 = arith.constant 0 : i32
    %c0_i32_0 = arith.constant 0 : i32
    %c0_i32_1 = arith.constant 0 : i32
    return %arg0, %c0_i32, %c0_i32_0 : i32, i32, i32
  }
  func.func @transform_1(%arg0: i32) -> (i32, i32) {
    %c0_i32 = arith.constant 0 : i32
    %c0_i32_0 = arith.constant 0 : i32
    %c0_i32_1 = arith.constant 0 : i32
    return %c0_i32, %c0_i32_0 : i32, i32
  }
  func.func @transform_2(%arg0: i32) -> (i32, i32) {
    %c0_i32 = arith.constant 0 : i32
    %c0_i32_0 = arith.constant 0 : i32
    %c0_i32_1 = arith.constant 0 : i32
    return %c0_i32, %c0_i32_0 : i32, i32
  }
  func.func @transform_3(%arg0: i32) -> (i32, i32) {
    %c0_i32 = arith.constant 0 : i32
    %c0_i32_0 = arith.constant 0 : i32
    %c0_i32_1 = arith.constant 0 : i32
    return %c0_i32, %c0_i32_0 : i32, i32
  }
  func.func @transform_4(%arg0: i32) -> (i32, i32) {
    %c0_i32 = arith.constant 0 : i32
    %c0_i32_0 = arith.constant 0 : i32
    %c0_i32_1 = arith.constant 0 : i32
    return %c0_i32, %c0_i32_0 : i32, i32
  }
  func.func @transform_5(%arg0: i32) -> (i32, i32) {
    %c0_i32 = arith.constant 0 : i32
    %c0_i32_0 = arith.constant 0 : i32
    %c0_i32_1 = arith.constant 0 : i32
    return %c0_i32, %c0_i32_0 : i32, i32
  }
  func.func @transform_6(%arg0: i32) -> (i32, i32) {
    %c0_i32 = arith.constant 0 : i32
    %c0_i32_0 = arith.constant 0 : i32
    return %arg0, %c0_i32 : i32, i32
  }
}

</mosaic_0001>

<bundles_post_ra>
// kernel: tpu_custom_call.1
= control target key start
LH: loop header
LB: loop body
LE: loop exit
PB: predicated region body
PF: predicated region fallthrough
CT: control target
= control target key end

     0   :  { %v1569_v1 = vmov 1   ;;  %v1570_v2 = vmov 0   ;;  %s2200_s0 = inlined_call_operand.vmem [shape: f32[1,2,256], index: 0, kind: input, shape index: {}]   ;;  %s2201_s1 = inlined_call_operand.vmem [shape: f32[128,7], index: 1, kind: input, shape index: {}]   ;;  %s2202_s2 = inlined_call_operand.vmem [shape: f32[128,128], index: 2, kind: input, shape index: {}]   ;;  %s2203_s3 = inlined_call_operand.vmem [shape: f32[128,128], index: 3, kind: input, shape index: {}]   ;;  %s2204_s4 = inlined_call_operand.vmem [shape: f32[256,16], index: 4, kind: input, shape index: {}]   ;;  %s2205_s5 = inlined_call_operand.vmem [shape: f32[16,256], index: 5, kind: input, shape index: {}]   ;;  %s2206_s6 = inlined_call_operand.hbm [shape: f32[1,256], index: 6, kind: output, shape index: {}]  }
   0x1   :  { %v1617_v0 = vld [vmem:[%s2201_s1] sm:$0xff]  ;;  %1505 = vset.pattern.permute.xlu1 %v1569_v1  ;;  %1504 = vset.pattern.permute.xlu0 %v1570_v2  ;;  %v1626_v3 = vld [vmem:[%s2201_s1 + $0x8] sm:$0xff] }
   0x2   :  { %173 = vperm.xlu1 %1505, %v1617_v0   ;;  %43 = vperm.xlu0 %1504, %v1617_v0  }
   0x3   :  { %11 = vsyncpa [#allocation3], 0  ;;  %v1633_v4 = vld [vmem:[%s2201_s1 + $0x10] sm:$0xff]  ;;  %v1638_v5 = vld [vmem:[%s2201_s1 + $0x18] sm:$0xff]  ;;  %v1571_v7 = vmov 2   ;;  %v2207_v26 = vlaneseq  ;;  %v1572_v36 = vmov 0.0  }
   0x4   :  { %v1650_v6 = vld [vmem:[%s2201_s1 + $0x20] sm:$0xff]  ;;  %v1657_v8 = vld [vmem:[%s2201_s1 + $0x30] sm:$0xff]  ;;  %v1672_v10 = vld [vmem:[%s2201_s1 + $0x28] sm:$0xff]  ;;  %590 = vmatprep.mubr.f32.mxu0 %v1572_v36  ;;  %863 = vmatprep.mubr.f32.mxu1 %v1572_v36  ;;  %vm1242_vm0 = vcmask 130048  }
   0x5   :  { %v1664_v9 = vld [vmem:[%s2201_s1 + $0x40] sm:$0xff]  ;;  %v1677_v11 = vld [vmem:[%s2201_s1 + $0x50] sm:$0xff]  ;;  %v1704_v14 = vld [vmem:[%s2201_s1 + $0x38] sm:$0xff]  ;;  %v1770_v29 = vshrl.u32 %v2207_v26, 7 }
   0x6   :  { %177 = vperm.xlu1 %1505, %v1626_v3   ;;  %48 = vperm.xlu0 %1504, %v1626_v3   ;;  %v1684_v12 = vld [vmem:[%s2201_s1 + $0x60] sm:$0xff]  ;;  %v1692_v13 = vld [vmem:[%s2201_s1 + $0x70] sm:$0xff]  ;;  %v1717_v15 = vld [vmem:[%s2201_s1 + $0x48] sm:$0xff] }
   0x7   :  { %v1724_v16 = vld [vmem:[%s2201_s1 + $0x58] sm:$0xff]  ;;  %v1731_v17 = vld [vmem:[%s2201_s1 + $0x68] sm:$0xff]  ;;  %v238_v32 = vsub.s32 1, %v1770_v29  ;;  %v242_v33 = vsub.s32 3, %v1770_v29  ;;  %v124_v34 = vsub.s32 0, %v1770_v29  ;;  %v128_v35 = vsub.s32 2, %v1770_v29 }
   0x8   :  { %v1758_v18 = vld [vmem:[%s2201_s1 + $0x78] sm:$0xff]  ;;  %v24_v37 = vld [vmem:[%s2200_s0] sm:$0xf] }
   0x9   :  { %v239_v40 = vrot.slane %v24_v37, %v238_v32  ;;  %v243_v41 = vrot.slane %v24_v37, %v242_v33  ;;  %v125_v42 = vrot.slane %v24_v37, %v124_v34  ;;  %v129_v43 = vrot.slane %v24_v37, %v128_v35 }
   0xa   :  { %1506 = vset.pattern.permute.xlu1 %v1570_v2  ;;  %53 = vperm.xlu0 %1504, %v1633_v4  }
   0xb   :  { %58 = vperm.xlu1 %1506, %v1638_v5   ;;  %v1791_v46 = vrot.slane %v239_v40, %v238_v32  ;;  %v1793_v47 = vrot.slane %v243_v41, %v238_v32  ;;  %v1795_v48 = vrot.slane %v125_v42, %v124_v34  ;;  %v1797_v49 = vrot.slane %v129_v43, %v124_v34 }
   0xe   :  { %1507 = vset.pattern.permute.xlu0 %v1569_v1 }
   0xf   :  { %1508 = vset.pattern.permute.xlu1 %v1569_v1  ;;  %181 = vperm.xlu0 %1507, %v1633_v4  }
  0x10   :  { %185 = vperm.xlu1 %1508, %v1638_v5  }
  0x13   :  { %189 = vperm.xlu0 %1507, %v1650_v6  }
  0x14   :  { %1509 = vset.pattern.permute.xlu1 %v1571_v7 }
  0x15   :  { %319 = vperm.xlu1 %1509, %v1617_v0  }
  0x17   :  { %197 = vperm.xlu0 %1507, %v1657_v8  }
  0x19   :  { %1510 = vset.pattern.permute.xlu1 %v1570_v2 }
  0x1a   :  { %63 = vperm.xlu1 %1510, %v1650_v6  }
  0x1b   :  { %205 = vperm.xlu0 %1507, %v1664_v9  }
  0x1e   :  { %68 = vperm.xlu1 %1510, %v1672_v10  }
  0x1f   :  { %213 = vperm.xlu0 %1507, %v1677_v11  }
  0x22   :  { %1511 = vset.pattern.permute.xlu1 %v1569_v1 }
  0x23   :  { %193 = vperm.xlu1 %1511, %v1672_v10   ;;  %221 = vperm.xlu0 %1507, %v1684_v12  }
  0x27   :  { %1512 = vset.pattern.permute.xlu1 %v1571_v7  ;;  %229 = vperm.xlu0 %1507, %v1692_v13  }
  0x28   :  { %327 = vperm.xlu1 %1512, %v1633_v4  }
  0x2b   :  { %1526 = vset.pattern.permute.xlu0 %v1571_v7 }
  0x2c   :  { %1513 = vset.pattern.permute.xlu1 %v1570_v2  ;;  %323 = vperm.xlu0 %1526, %v1626_v3  }
  0x2d   :  { %73 = vperm.xlu1 %1513, %v1657_v8  }
  0x30   :  { %331 = vperm.xlu0 %1526, %v1638_v5  }
  0x31   :  { %78 = vperm.xlu1 %1513, %v1704_v14  }
  0x34   :  { %339 = vperm.xlu0 %1526, %v1672_v10  }
  0x35   :  { %1514 = vset.pattern.permute.xlu1 %v1569_v1 }
  0x36   :  { %201 = vperm.xlu1 %1514, %v1704_v14  }
  0x38   :  { %347 = vperm.xlu0 %1526, %v1704_v14  }
  0x3a   :  { %1515 = vset.pattern.permute.xlu1 %v1571_v7 }
  0x3b   :  { %335 = vperm.xlu1 %1515, %v1650_v6  }
  0x3c   :  { %355 = vperm.xlu0 %1526, %v1717_v15  }
  0x3f   :  { %1516 = vset.pattern.permute.xlu1 %v1570_v2 }
  0x40   :  { %83 = vperm.xlu1 %1516, %v1664_v9   ;;  %363 = vperm.xlu0 %1526, %v1724_v16  }
  0x44   :  { %88 = vperm.xlu1 %1516, %v1717_v15   ;;  %371 = vperm.xlu0 %1526, %v1731_v17  }
  0x48   :  { %1517 = vset.pattern.permute.xlu1 %v1569_v1 }
  0x49   :  { %209 = vperm.xlu1 %1517, %v1717_v15  }
  0x4d   :  { %1518 = vset.pattern.permute.xlu1 %v1571_v7 }
  0x4e   :  { %343 = vperm.xlu1 %1518, %v1657_v8  }
  0x52   :  { %1519 = vset.pattern.permute.xlu1 %v1570_v2 }
  0x53   :  { %93 = vperm.xlu1 %1519, %v1677_v11  }
  0x57   :  { %98 = vperm.xlu1 %1519, %v1724_v16  }
  0x5b   :  { %1520 = vset.pattern.permute.xlu1 %v1569_v1 }
  0x5c   :  { %217 = vperm.xlu1 %1520, %v1724_v16  }
  0x60   :  { %1521 = vset.pattern.permute.xlu1 %v1571_v7 }
  0x61   :  { %351 = vperm.xlu1 %1521, %v1664_v9  }
  0x65   :  { %1522 = vset.pattern.permute.xlu1 %v1570_v2 }
  0x66   :  { %103 = vperm.xlu1 %1522, %v1684_v12  }
  0x6a   :  { %108 = vperm.xlu1 %1522, %v1731_v17  }
  0x6e   :  { %1523 = vset.pattern.permute.xlu1 %v1569_v1 }
  0x6f   :  { %225 = vperm.xlu1 %1523, %v1731_v17  }
  0x73   :  { %1524 = vset.pattern.permute.xlu1 %v1571_v7 }
  0x74   :  { %359 = vperm.xlu1 %1524, %v1677_v11  }
  0x78   :  { %1525 = vset.pattern.permute.xlu1 %v1570_v2 }
  0x79   :  { %113 = vperm.xlu1 %1525, %v1692_v13  }
  0x7d   :  { %118 = vperm.xlu1 %1525, %v1758_v18  }
  0x81   :  { %1527 = vset.pattern.permute.xlu1 %v1569_v1  ;;  %v174_v19 = vpop.permute.xlu1 %173  ;;  %v44_v20 = vpop.permute.xlu0 %43 }
  0x82   :  { %233 = vperm.xlu1 %1527, %v1758_v18   ;;  %v254_v52 = vmul.f32 %v1791_v46, %v174_v19  ;;  %v255_v53 = vmul.f32 %v1793_v47, %v174_v19  ;;  %v140_v54 = vmul.f32 %v1795_v48, %v44_v20  ;;  %v141_v55 = vmul.f32 %v1797_v49, %v44_v20 }
  0x84   :  { %v286_v2 = vadd.f32 %v254_v52, %v140_v54 }
  0x85   :  { %v178_v21 = vpop.permute.xlu1 %177  ;;  %v49_v22 = vpop.permute.xlu0 %48 }
  0x86   :  { %1528 = vset.pattern.permute.xlu1 %v1571_v7  ;;  %v256_v56 = vmul.f32 %v1791_v46, %v178_v21  ;;  %v257_v57 = vmul.f32 %v1793_v47, %v178_v21  ;;  %v142_v58 = vmul.f32 %v1795_v48, %v49_v22  ;;  %v143_v59 = vmul.f32 %v1797_v49, %v49_v22 }
  0x87   :  { %367 = vperm.xlu1 %1528, %v1684_v12   ;;  %v287_v7 = vadd.f32 %v255_v53, %v141_v55 }
  0x88   :  { %v288_v35 = vadd.f32 %v256_v56, %v142_v58  ;;  %v289_v37 = vadd.f32 %v257_v57, %v143_v59 }
  0x89   :  { %v54_v23 = vpop.permute.xlu0 %53 }
  0x8a   :  { %v59_v24 = vpop.permute.xlu1 %58  ;;  %v144_v60 = vmul.f32 %v1795_v48, %v54_v23  ;;  %v145_v61 = vmul.f32 %v1797_v49, %v54_v23 }
  0x8b   :  { %375 = vperm.xlu1 %1528, %v1692_v13   ;;  %v146_v23 = vmul.f32 %v1795_v48, %v59_v24  ;;  %v147_v40 = vmul.f32 %v1797_v49, %v59_v24 }
  0x8e   :  { %v182_v25 = vpop.permute.xlu0 %181 }
  0x8f   :  { %379 = vperm.xlu1 %1528, %v1758_v18   ;;  %v186_v27 = vpop.permute.xlu1 %185  ;;  %v258_v62 = vmul.f32 %v1791_v46, %v182_v25  ;;  %v259_v63 = vmul.f32 %v1793_v47, %v182_v25 }
  0x90   :  { %v260_v20 = vmul.f32 %v1791_v46, %v186_v27  ;;  %v261_v21 = vmul.f32 %v1793_v47, %v186_v27 }
  0x91   :  { %v290_v22 = vadd.f32 %v258_v62, %v144_v60  ;;  %v291_v34 = vadd.f32 %v259_v63, %v145_v61 }
  0x92   :  { %v1767_v28 = vpop.permute.xlu0 %189  ;;  %v292_v52 = vadd.f32 %v260_v20, %v146_v23  ;;  %v293_v53 = vadd.f32 %v261_v21, %v147_v40 }
  0x94   :  { %v320_v30 = vpop.permute.xlu1 %319 }
  0x95   :  { %v382_v32 = vadd.f32 %v320_v30, %v286_v2  ;;  %v383_v33 = vadd.f32 %v320_v30, %v287_v7 }
  0x96   :  { %v1772_v31 = vpop.permute.xlu0 %197 }
  0x97   :  { %v415_v54 = vmax.f32 %v383_v33, 0.0  ;;  %v414_v55 = vmax.f32 %v382_v32, 0.0  ;;  %v263_v32 = vmul.f32 %v1793_v47, %v1767_v28 }
  0x99   :  { %v1783_v38 = vpop.permute.xlu1 %63 }
  0x9a   :  { %v1785_v39 = vpop.permute.xlu0 %205 }
  0x9d   :  { %v1787_v44 = vpop.permute.xlu1 %68 }
  0x9e   :  { %v1789_v45 = vpop.permute.xlu0 %213 }
  0xa2   :  { %v194_v50 = vpop.permute.xlu1 %193  ;;  %v1799_v51 = vpop.permute.xlu0 %221 }
  0xa3   :  { %v264_v20 = vmul.f32 %v1791_v46, %v194_v50  ;;  %v265_v21 = vmul.f32 %v1793_v47, %v194_v50  ;;  %v151_v50 = vmul.f32 %v1797_v49, %v1787_v44 }
  0xa6   :  { %v1813_v1 = vpop.permute.xlu0 %229 }
  0xa7   :  { %v328_v19 = vpop.permute.xlu1 %327 }
  0xa8   :  { %v386_v26 = vadd.f32 %v328_v19, %v290_v22  ;;  %v387_v27 = vadd.f32 %v328_v19, %v291_v34  ;;  %v262_v19 = vmul.f32 %v1791_v46, %v1767_v28  ;;  %v149_v34 = vmul.f32 %v1797_v49, %v1783_v38 }
  0xaa   :  { %v418_v62 = vmax.f32 %v386_v26, 0.0  ;;  %v419_v24 = vmax.f32 %v387_v27, 0.0  ;;  %v148_v26 = vmul.f32 %v1795_v48, %v1783_v38 }
  0xab   :  { %v324_v25 = vpop.permute.xlu0 %323 }
  0xac   :  { %v384_v41 = vadd.f32 %v324_v25, %v288_v35  ;;  %v385_v42 = vadd.f32 %v324_v25, %v289_v37  ;;  %v74_v43 = vpop.permute.xlu1 %73  ;;  %v150_v35 = vmul.f32 %v1795_v48, %v1787_v44  ;;  %v297_v25 = vadd.f32 %v265_v21, %v151_v50 }
  0xad   :  { %v153_v21 = vmul.f32 %v1797_v49, %v74_v43 }
  0xae   :  { %v416_v2 = vmax.f32 %v384_v41, 0.0  ;;  %v417_v30 = vmax.f32 %v385_v42, 0.0  ;;  %v296_v40 = vadd.f32 %v264_v20, %v150_v35  ;;  %v294_v42 = vadd.f32 %v262_v19, %v148_v26 }
  0xaf   :  { %v332_v60 = vpop.permute.xlu0 %331  ;;  %v152_v20 = vmul.f32 %v1795_v48, %v74_v43 }
  0xb0   :  { %v388_v61 = vadd.f32 %v332_v60, %v292_v52  ;;  %v389_v56 = vadd.f32 %v332_v60, %v293_v53  ;;  %v79_v57 = vpop.permute.xlu1 %78  ;;  %v1394_v58 = vpack.c.bf16 %v417_v30, %v415_v54  ;;  %v1396_v59 = vpack.c.bf16 %v416_v2, %v414_v55 }
  0xb1   :  { %v295_v52 = vadd.f32 %v263_v32, %v149_v34 }
  0xb2   :  { %v420_v63 = vmax.f32 %v388_v61, 0.0  ;;  %v421_v7 = vmax.f32 %v389_v56, 0.0  ;;  %1395 = vmatprep.subr.bf16.mxu0 %v1394_v58 }
  0xb3   :  { %1397 = vmatpush1.bf16.msra.mxu0 %v1396_v59  ;;  %v340_v23 = vpop.permute.xlu0 %339 }
  0xb4   :  { %v1398_v33 = vpack.c.bf16 %v421_v7, %v419_v24  ;;  %v1400_v22 = vpack.c.bf16 %v420_v63, %v418_v62  ;;  %v392_v28 = vadd.f32 %v340_v23, %v296_v40  ;;  %v393_v41 = vadd.f32 %v340_v23, %v297_v25 }
  0xb5   :  { %v202_v37 = vpop.permute.xlu1 %201  ;;  %v154_v62 = vmul.f32 %v1795_v48, %v79_v57  ;;  %v155_v24 = vmul.f32 %v1797_v49, %v79_v57  ;;  %v266_v63 = vmul.f32 %v1791_v46, %v1772_v31  ;;  %v267_v7 = vmul.f32 %v1793_v47, %v1772_v31 }
  0xb6   :  { %1399 = vmatprep.subr.bf16.mxu0 %v1398_v33  ;;  %v424_v38 = vmax.f32 %v392_v28, 0.0  ;;  %v425_v27 = vmax.f32 %v393_v41, 0.0  ;;  %v268_v58 = vmul.f32 %v1791_v46, %v202_v37  ;;  %v269_v59 = vmul.f32 %v1793_v47, %v202_v37 }
  0xb7   :  { %1401 = vmatpush1.bf16.msra.mxu0 %v1400_v22  ;;  %v348_v22 = vpop.permute.xlu0 %347  ;;  %v298_v35 = vadd.f32 %v266_v63, %v152_v20  ;;  %v299_v50 = vadd.f32 %v267_v7, %v153_v21 }
  0xb8   :  { %v300_v19 = vadd.f32 %v268_v58, %v154_v62  ;;  %v301_v32 = vadd.f32 %v269_v59, %v155_v24 }
  0xba   :  { %v336_v53 = vpop.permute.xlu1 %335  ;;  %v396_v26 = vadd.f32 %v348_v22, %v300_v19  ;;  %v397_v34 = vadd.f32 %v348_v22, %v301_v32 }
  0xbb   :  { %v390_v54 = vadd.f32 %v336_v53, %v294_v42  ;;  %v391_v55 = vadd.f32 %v336_v53, %v295_v52  ;;  %v1573_v53 = vmov 3   ;;  %v356_v24 = vpop.permute.xlu0 %355 }
  0xbc   :  { %v428_v40 = vmax.f32 %v396_v26, 0.0  ;;  %v429_v25 = vmax.f32 %v397_v34, 0.0  ;;  %1529 = vset.pattern.permute.xlu0 %v1573_v53  ;;  %1530 = vset.pattern.permute.xlu1 %v1573_v53 }
  0xbd   :  { %v422_v2 = vmax.f32 %v390_v54, 0.0  ;;  %v423_v30 = vmax.f32 %v391_v55, 0.0  ;;  %463 = vperm.xlu0 %1529, %v1617_v0   ;;  %467 = vperm.xlu1 %1530, %v1626_v3  }
  0xbf   :  { %v84_v60 = vpop.permute.xlu1 %83  ;;  %v1402_v61 = vpack.c.bf16 %v425_v27, %v423_v30  ;;  %v1404_v44 = vpack.c.bf16 %v424_v38, %v422_v2  ;;  %v270_v2 = vmul.f32 %v1791_v46, %v1785_v39  ;;  %v271_v30 = vmul.f32 %v1793_v47, %v1785_v39 }
  0xc1   :  { %1403 = vmatprep.subr.bf16.mxu0 %v1402_v61  ;;  %v156_v61 = vmul.f32 %v1795_v48, %v84_v60  ;;  %471 = vperm.xlu1 %1530, %v1633_v4  }
  0xc2   :  { %1405 = vmatpush1.bf16.msra.mxu0 %v1404_v44  ;;  %v157_v44 = vmul.f32 %v1797_v49, %v84_v60  ;;  %475 = vperm.xlu0 %1529, %v1638_v5  }
  0xc3   :  { %v89_v56 = vpop.permute.xlu1 %88  ;;  %v302_v63 = vadd.f32 %v270_v2, %v156_v61 }
  0xc4   :  { %v158_v38 = vmul.f32 %v1795_v48, %v89_v56  ;;  %v159_v27 = vmul.f32 %v1797_v49, %v89_v56  ;;  %v303_v20 = vadd.f32 %v271_v30, %v157_v44 }
  0xc5   :  { %479 = vperm.xlu1 %1530, %v1650_v6  }
  0xc6   :  { %483 = vperm.xlu0 %1529, %v1672_v10  }
  0xc8   :  { %v210_v33 = vpop.permute.xlu1 %209 }
  0xc9   :  { %v272_v54 = vmul.f32 %v1791_v46, %v210_v33  ;;  %v273_v55 = vmul.f32 %v1793_v47, %v210_v33  ;;  %487 = vperm.xlu1 %1530, %v1657_v8  }
  0xca   :  { %491 = vperm.xlu0 %1529, %v1704_v14  }
  0xcb   :  { %v304_v58 = vadd.f32 %v272_v54, %v158_v38  ;;  %v305_v59 = vadd.f32 %v273_v55, %v159_v27  ;;  %v364_v55 = vpop.permute.xlu0 %363 }
  0xcd   :  { %v344_v37 = vpop.permute.xlu1 %343  ;;  %v400_v56 = vadd.f32 %v356_v24, %v304_v58  ;;  %v401_v7 = vadd.f32 %v356_v24, %v305_v59  ;;  %495 = vperm.xlu1 %1530, %v1664_v9  }
  0xce   :  { %v394_v57 = vadd.f32 %v344_v37, %v298_v35  ;;  %v395_v23 = vadd.f32 %v344_v37, %v299_v50  ;;  %499 = vperm.xlu0 %1529, %v1717_v15  }
  0xcf   :  { %v432_v60 = vmax.f32 %v400_v56, 0.0  ;;  %v433_v32 = vmax.f32 %v401_v7, 0.0 }
  0xd0   :  { %v426_v28 = vmax.f32 %v394_v57, 0.0  ;;  %v427_v41 = vmax.f32 %v395_v23, 0.0 }
  0xd1   :  { %503 = vperm.xlu1 %1530, %v1677_v11  }
  0xd2   :  { %v94_v31 = vpop.permute.xlu1 %93  ;;  %v1406_v42 = vpack.c.bf16 %v429_v25, %v427_v41  ;;  %v1408_v52 = vpack.c.bf16 %v428_v40, %v426_v28  ;;  %507 = vperm.xlu0 %1529, %v1724_v16   ;;  %v274_v25 = vmul.f32 %v1791_v46, %v1789_v45  ;;  %v275_v28 = vmul.f32 %v1793_v47, %v1789_v45 }
  0xd3   :  { %v160_v41 = vmul.f32 %v1795_v48, %v94_v31 }
  0xd4   :  { %1407 = vmatprep.subr.bf16.mxu0 %v1406_v42  ;;  %v161_v42 = vmul.f32 %v1797_v49, %v94_v31 }
  0xd5   :  { %1409 = vmatpush1.bf16.msra.mxu0 %v1408_v52  ;;  %511 = vperm.xlu1 %1530, %v1684_v12   ;;  %v306_v27 = vadd.f32 %v274_v25, %v160_v41 }
  0xd6   :  { %v99_v43 = vpop.permute.xlu1 %98  ;;  %515 = vperm.xlu0 %1529, %v1731_v17   ;;  %v307_v2 = vadd.f32 %v275_v28, %v161_v42 }
  0xd7   :  { %v162_v23 = vmul.f32 %v1795_v48, %v99_v43  ;;  %v163_v40 = vmul.f32 %v1797_v49, %v99_v43 }
  0xd9   :  { %519 = vperm.xlu1 %1530, %v1692_v13  }
  0xda   :  { %523 = vperm.xlu0 %1529, %v1758_v18  }
  0xdb   :  { %v218_v62 = vpop.permute.xlu1 %217 }
  0xdc   :  { %v276_v37 = vmul.f32 %v1791_v46, %v218_v62  ;;  %v277_v57 = vmul.f32 %v1793_v47, %v218_v62 }
  0xde   :  { %v308_v52 = vadd.f32 %v276_v37, %v162_v23  ;;  %v309_v53 = vadd.f32 %v277_v57, %v163_v40  ;;  %v279_v37 = vmul.f32 %v1793_v47, %v1799_v51 }
  0xe0   :  { %v352_v39 = vpop.permute.xlu1 %351  ;;  %v404_v43 = vadd.f32 %v364_v55, %v308_v52  ;;  %v405_v38 = vadd.f32 %v364_v55, %v309_v53  ;;  %v283_v53 = vmul.f32 %v1793_v47, %v1813_v1 }
  0xe1   :  { %v398_v21 = vadd.f32 %v352_v39, %v302_v63  ;;  %v399_v19 = vadd.f32 %v352_v39, %v303_v20 }
  0xe2   :  { %v436_v31 = vmax.f32 %v404_v43, 0.0  ;;  %v437_v44 = vmax.f32 %v405_v38, 0.0 }
  0xe3   :  { %v430_v33 = vmax.f32 %v398_v21, 0.0  ;;  %v431_v22 = vmax.f32 %v399_v19, 0.0 }
  0xe5   :  { %v104_v26 = vpop.permute.xlu1 %103  ;;  %v1410_v34 = vpack.c.bf16 %v433_v32, %v431_v22  ;;  %v1412_v35 = vpack.c.bf16 %v432_v60, %v430_v33  ;;  %v372_v22 = vpop.permute.xlu0 %371 }
  0xe6   :  { %v164_v32 = vmul.f32 %v1795_v48, %v104_v26  ;;  %v165_v33 = vmul.f32 %v1797_v49, %v104_v26  ;;  %v282_v26 = vmul.f32 %v1791_v46, %v1813_v1 }
  0xe7   :  { %1411 = vmatprep.subr.bf16.mxu0 %v1410_v34 }
  0xe8   :  { %1413 = vmatpush1.bf16.msra.mxu0 %v1412_v35  ;;  %v278_v35 = vmul.f32 %v1791_v46, %v1799_v51  ;;  %v311_v25 = vadd.f32 %v279_v37, %v165_v33  ;;  %v450_v33 = vld [vmem:[%s2202_s2 + $0x20] sm:$0xff] }
  0xe9   :  { %v109_v50 = vpop.permute.xlu1 %108  ;;  %v454_v37 = vld [vmem:[%s2202_s2 + $0x40] sm:$0xff] }
  0xea   :  { %v166_v39 = vmul.f32 %v1795_v48, %v109_v50  ;;  %v167_v21 = vmul.f32 %v1797_v49, %v109_v50  ;;  %v310_v40 = vadd.f32 %v278_v35, %v164_v32  ;;  %v449_v32 = vld [vmem:[%s2202_s2 + $0x18] sm:$0xff] }
  0xeb   :  { %v453_v35 = vld [vmem:[%s2202_s2 + $0x38] sm:$0xff] }
  0xee   :  { %v226_v54 = vpop.permute.xlu1 %225 }
  0xef   :  { %v280_v56 = vmul.f32 %v1791_v46, %v226_v54  ;;  %v281_v7 = vmul.f32 %v1793_v47, %v226_v54 }
  0xf1   :  { %v312_v19 = vadd.f32 %v280_v56, %v166_v39  ;;  %v313_v60 = vadd.f32 %v281_v7, %v167_v21 }
  0xf3   :  { %v360_v30 = vpop.permute.xlu1 %359  ;;  %v408_v57 = vadd.f32 %v372_v22, %v312_v19  ;;  %v409_v23 = vadd.f32 %v372_v22, %v313_v60  ;;  %v451_v22 = vld [vmem:[%s2202_s2 + $0x28] sm:$0xff] }
  0xf4   :  { %v402_v45 = vadd.f32 %v360_v30, %v306_v27  ;;  %v403_v61 = vadd.f32 %v360_v30, %v307_v2 }
  0xf5   :  { %v440_v54 = vmax.f32 %v408_v57, 0.0  ;;  %v441_v55 = vmax.f32 %v409_v23, 0.0  ;;  %v455_v57 = vld [vmem:[%s2202_s2 + $0x48] sm:$0xff]  ;;  %v456_v23 = vld [vmem:[%s2202_s2 + $0x50] sm:$0xff] }
  0xf6   :  { %v434_v58 = vmax.f32 %v402_v45, 0.0  ;;  %v435_v59 = vmax.f32 %v403_v61, 0.0 }
  0xf8   :  { %v114_v62 = vpop.permute.xlu1 %113  ;;  %v1414_v24 = vpack.c.bf16 %v437_v44, %v435_v59  ;;  %v1416_v63 = vpack.c.bf16 %v436_v31, %v434_v58 }
  0xf9   :  { %v168_v50 = vmul.f32 %v1795_v48, %v114_v62  ;;  %v169_v28 = vmul.f32 %v1797_v49, %v114_v62 }
  0xfa   :  { %1415 = vmatprep.subr.bf16.mxu0 %v1414_v24 }
  0xfb   :  { %1417 = vmatpush1.bf16.msra.mxu0 %v1416_v63  ;;  %v314_v30 = vadd.f32 %v282_v26, %v168_v50  ;;  %v315_v45 = vadd.f32 %v283_v53, %v169_v28  ;;  %v459_v50 = vld [vmem:[%s2202_s2 + $0x68] sm:$0xff]  ;;  %v460_v28 = vld [vmem:[%s2202_s2 + $0x70] sm:$0xff] }
  0xfc   :  { %v119_v20 = vpop.permute.xlu1 %118 }
  0xfd   :  { %v170_v61 = vmul.f32 %v1795_v48, %v119_v20  ;;  %v171_v31 = vmul.f32 %v1797_v49, %v119_v20  ;;  %v446_v48 = vld [vmem:[%s2202_s2] sm:$0xff]  ;;  %v447_v49 = vld [vmem:[%s2202_s2 + $0x8] sm:$0xff]  ;;  %v448_v20 = vld [vmem:[%s2202_s2 + $0x10] sm:$0xff] }
 0x101   :  { %v234_v34 = vpop.permute.xlu1 %233 }
 0x102   :  { %v284_v51 = vmul.f32 %v1791_v46, %v234_v34  ;;  %v285_v43 = vmul.f32 %v1793_v47, %v234_v34  ;;  %v452_v34 = vld [vmem:[%s2202_s2 + $0x30] sm:$0xff] }
 0x104   :  { %v316_v1 = vadd.f32 %v284_v51, %v170_v61  ;;  %v317_v24 = vadd.f32 %v285_v43, %v171_v31 }
 0x106   :  { %v368_v41 = vpop.permute.xlu1 %367 }
 0x107   :  { %v406_v42 = vadd.f32 %v368_v41, %v310_v40  ;;  %v407_v52 = vadd.f32 %v368_v41, %v311_v25  ;;  %v457_v40 = vld [vmem:[%s2202_s2 + $0x58] sm:$0xff]  ;;  %v458_v25 = vld [vmem:[%s2202_s2 + $0x60] sm:$0xff] }
 0x108   :  { %v461_v41 = vld [vmem:[%s2202_s2 + $0x78] sm:$0xff] }
 0x109   :  { %v438_v38 = vmax.f32 %v406_v42, 0.0  ;;  %v439_v27 = vmax.f32 %v407_v52, 0.0  ;;  %v1574_v42 = vmov 4   ;;  %v1575_v52 = vmov 5  }
 0x10a   :  { %v376_v2 = vpop.permute.xlu1 %375  ;;  %1531 = vset.pattern.permute.xlu1 %v1574_v42  ;;  %1532 = vset.pattern.permute.xlu0 %v1574_v42 }
 0x10b   :  { %v1418_v44 = vpack.c.bf16 %v441_v55, %v439_v27  ;;  %v1420_v58 = vpack.c.bf16 %v440_v54, %v438_v38  ;;  %v410_v59 = vadd.f32 %v376_v2, %v314_v30  ;;  %v411_v62 = vadd.f32 %v376_v2, %v315_v45  ;;  %736 = vperm.xlu1 %1531, %v1617_v0  }
 0x10c   :  { %740 = vperm.xlu0 %1532, %v1626_v3  }
 0x10d   :  { %1419 = vmatprep.subr.bf16.mxu0 %v1418_v44  ;;  %v442_v56 = vmax.f32 %v410_v59, 0.0  ;;  %v443_v7 = vmax.f32 %v411_v62, 0.0 }
 0x10e   :  { %v380_v63 = vpop.permute.xlu1 %379  ;;  %1421 = vmatpush1.bf16.msra.mxu0 %v1420_v58 }
 0x10f   :  { %v412_v46 = vadd.f32 %v380_v63, %v316_v1  ;;  %v413_v47 = vadd.f32 %v380_v63, %v317_v24  ;;  %744 = vperm.xlu1 %1531, %v1633_v4  }
 0x110   :  { %1533 = vset.pattern.permute.xlu0 %v1575_v52 }
 0x111   :  { %v444_v39 = vmax.f32 %v412_v46, 0.0  ;;  %v445_v21 = vmax.f32 %v413_v47, 0.0  ;;  %993 = vperm.xlu0 %1533, %v1617_v0  }
 0x113   :  { %v1422_v19 = vpack.c.bf16 %v445_v21, %v443_v7  ;;  %v1424_v60 = vpack.c.bf16 %v444_v39, %v442_v56  ;;  %748 = vperm.xlu1 %1531, %v1638_v5  }
 0x115   :  { %1423 = vmatprep.subr.bf16.mxu0 %v1422_v19  ;;  %1001 = vperm.xlu0 %1533, %v1633_v4  }
 0x116   :  { %1425 = vmatpush1.bf16.msra.mxu0 %v1424_v60 }
 0x117   :  { %1534 = vset.pattern.permute.xlu1 %v1575_v52 }
 0x118   :  { %997 = vperm.xlu1 %1534, %v1626_v3  }
 0x119   :  { %591 = vmatmul.mubr.f32.vlgmr.msra.gmra.mrb[0].mxu0 %v446_v48  ;;  %1005 = vperm.xlu0 %1533, %v1638_v5  }
 0x11a   :  { %596 = vmatprep.mubr.f32.mxu0 %v1572_v36 }
 0x11c   :  { %1535 = vset.pattern.permute.xlu1 %v1574_v42 }
 0x11d   :  { %597 = vmatmul.mubr.f32.gmra.mrb[2].mxu0 %v447_v49  ;;  %752 = vperm.xlu1 %1535, %v1650_v6  }
 0x11e   :  { %602 = vmatprep.mubr.f32.mxu0 %v1572_v36  ;;  %1009 = vperm.xlu0 %1533, %v1650_v6  }
 0x121   :  { %603 = vmatmul.mubr.f32.gmra.mrb[4].mxu0 %v448_v20  ;;  %756 = vperm.xlu1 %1535, %v1672_v10  }
 0x122   :  { %608 = vmatprep.mubr.f32.mxu0 %v1572_v36  ;;  %1013 = vperm.xlu0 %1533, %v1672_v10  }
 0x125   :  { %609 = vmatmul.mubr.f32.gmra.mrb[6].mxu0 %v449_v32  ;;  %760 = vperm.xlu1 %1535, %v1657_v8  }
 0x126   :  { %614 = vmatprep.mubr.f32.mxu0 %v1572_v36  ;;  %1017 = vperm.xlu0 %1533, %v1657_v8  }
 0x129   :  { %615 = vmatmul.mubr.f32.gmra.mrb[8].mxu0 %v450_v33  ;;  %764 = vperm.xlu1 %1535, %v1704_v14  }
 0x12a   :  { %620 = vmatprep.mubr.f32.mxu0 %v1572_v36  ;;  %1021 = vperm.xlu0 %1533, %v1704_v14  }
 0x12d   :  { %621 = vmatmul.mubr.f32.gmra.mrb[10].mxu0 %v451_v22  ;;  %768 = vperm.xlu1 %1535, %v1664_v9  }
 0x12e   :  { %626 = vmatprep.mubr.f32.mxu0 %v1572_v36  ;;  %1025 = vperm.xlu0 %1533, %v1664_v9  }
 0x131   :  { %627 = vmatmul.mubr.f32.gmra.mrb[12].mxu0 %v452_v34  ;;  %772 = vperm.xlu1 %1535, %v1717_v15  }
 0x132   :  { %632 = vmatprep.mubr.f32.mxu0 %v1572_v36  ;;  %1029 = vperm.xlu0 %1533, %v1717_v15  }
 0x135   :  { %633 = vmatmul.mubr.f32.gmra.mrb[14].mxu0 %v453_v35  ;;  %776 = vperm.xlu1 %1535, %v1677_v11  }
 0x136   :  { %638 = vmatprep.mubr.f32.mxu0 %v1572_v36  ;;  %1033 = vperm.xlu0 %1533, %v1677_v11  }
 0x139   :  { %639 = vmatmul.mubr.f32.gmra.mrb[16].mxu0 %v454_v37  ;;  %780 = vperm.xlu1 %1535, %v1724_v16  }
 0x13a   :  { %644 = vmatprep.mubr.f32.mxu0 %v1572_v36  ;;  %1037 = vperm.xlu0 %1533, %v1724_v16  }
 0x13c   :  { %v464_v26 = vpop.permute.xlu0 %463  ;;  %v468_v55 = vpop.permute.xlu1 %467 }
 0x13d   :  { %645 = vmatmul.mubr.f32.gmra.mrb[18].mxu0 %v455_v57  ;;  %784 = vperm.xlu1 %1535, %v1684_v12  }
 0x13e   :  { %650 = vmatprep.mubr.f32.mxu0 %v1572_v36  ;;  %1041 = vperm.xlu0 %1533, %v1684_v12  }
 0x140   :  { %v472_v30 = vpop.permute.xlu1 %471 }
 0x141   :  { %651 = vmatmul.mubr.f32.gmra.mrb[20].mxu0 %v456_v23  ;;  %v476_v58 = vpop.permute.xlu0 %475  ;;  %788 = vperm.xlu1 %1535, %v1731_v17  }
 0x142   :  { %656 = vmatprep.mubr.f32.mxu0 %v1572_v36  ;;  %1045 = vperm.xlu0 %1533, %v1731_v17  }
 0x144   :  { %v480_v21 = vpop.permute.xlu1 %479 }
 0x145   :  { %657 = vmatmul.mubr.f32.gmra.mrb[22].mxu0 %v457_v40  ;;  %v484_v48 = vpop.permute.xlu0 %483  ;;  %792 = vperm.xlu1 %1535, %v1692_v13  }
 0x146   :  { %662 = vmatprep.mubr.f32.mxu0 %v1572_v36  ;;  %1053 = vperm.xlu0 %1533, %v1758_v18  }
 0x148   :  { %v488_v40 = vpop.permute.xlu1 %487 }
 0x149   :  { %663 = vmatmul.mubr.f32.gmra.mrb[24].mxu0 %v458_v25  ;;  %796 = vperm.xlu1 %1535, %v1758_v18   ;;  %v1543_v18 = vld [vmem:[%s2201_s1 + $0x70] sm:$0xff] }
 0x14a   :  { %668 = vmatprep.mubr.f32.mxu0 %v1572_v36 }
 0x14d   :  { %669 = vmatmul.mubr.f32.gmra.mrb[26].mxu0 %v459_v50  ;;  %1536 = vset.pattern.permute.xlu1 %v1575_v52  ;;  %v1544_v52 = vld [vmem:[%s2201_s1] sm:$0xff] }
 0x14e   :  { %674 = vmatprep.mubr.f32.mxu0 %v1572_v36  ;;  %1049 = vperm.xlu1 %1536, %v1543_v18  }
 0x151   :  { %675 = vmatmul.mubr.f32.gmra.mrb[28].mxu0 %v460_v28  ;;  %v492_v28 = vpop.permute.xlu0 %491 }
 0x152   :  { %680 = vmatprep.mubr.f32.mxu0 %v1572_v36 }
 0x155   :  { %681 = vmatmul.mubr.f32.gmra.mrb[30].mxu0 %v461_v41 }
 0x1ec   :  { %v592_v53 = vpop.f32.mrb[0].mxu0 }
 0x1ed   :  { %v594_v54 = vpop.f32.mrb[1].mxu0  ;;  %v593_v0 = vadd.f32 %v592_v53, %v464_v26 }
 0x1ee   :  { %v595_v51 = vadd.f32 %v594_v54, %v464_v26 }
 0x1ef   :  { %v687_v38 = vmax.f32 %v593_v0, 0.0 }
 0x1f0   :  { %v598_v3 = vpop.f32.mrb[2].mxu0  ;;  %v688_v6 = vmax.f32 %v595_v51, 0.0 }
 0x1f1   :  { %v599_v4 = vadd.f32 %v598_v3, %v468_v55  ;;  %v600_v43 = vpop.f32.mrb[3].mxu0 }
 0x1f2   :  { %v601_v5 = vadd.f32 %v600_v43, %v468_v55  ;;  %v496_v43 = vpop.permute.xlu1 %495 }
 0x1f3   :  { %v689_v27 = vmax.f32 %v599_v4, 0.0 }
 0x1f4   :  { %v690_v2 = vmax.f32 %v601_v5, 0.0  ;;  %v604_v45 = vpop.f32.mrb[4].mxu0 }
 0x1f5   :  { %v606_v61 = vpop.f32.mrb[5].mxu0  ;;  %v1428_v31 = vpack.c.bf16 %v689_v27, %v687_v38  ;;  %v605_v44 = vadd.f32 %v604_v45, %v472_v30  ;;  %v500_v27 = vpop.permute.xlu0 %499 }
 0x1f6   :  { %v1426_v10 = vpack.c.bf16 %v690_v2, %v688_v6  ;;  %v607_v59 = vadd.f32 %v606_v61, %v472_v30 }
 0x1f7   :  { %v691_v63 = vmax.f32 %v605_v44, 0.0 }
 0x1f8   :  { %v610_v62 = vpop.f32.mrb[6].mxu0  ;;  %1427 = vmatprep.subr.bf16.mxu1 %v1426_v10  ;;  %v692_v47 = vmax.f32 %v607_v59, 0.0 }
 0x1f9   :  { %v611_v1 = vadd.f32 %v610_v62, %v476_v58  ;;  %v612_v8 = vpop.f32.mrb[7].mxu0  ;;  %1429 = vmatpush1.bf16.msra.mxu1 %v1428_v31  ;;  %v504_v62 = vpop.permute.xlu1 %503 }
 0x1fa   :  { %v613_v24 = vadd.f32 %v612_v8, %v476_v58  ;;  %v508_v13 = vpop.permute.xlu0 %507 }
 0x1fb   :  { %v693_v46 = vmax.f32 %v611_v1, 0.0 }
 0x1fc   :  { %v694_v56 = vmax.f32 %v613_v24, 0.0  ;;  %v616_v7 = vpop.f32.mrb[8].mxu0  ;;  %v1576_v24 = vmov 6  }
 0x1fd   :  { %v1432_v14 = vpack.c.bf16 %v693_v46, %v691_v63  ;;  %v618_v39 = vpop.f32.mrb[9].mxu0  ;;  %v617_v60 = vadd.f32 %v616_v7, %v480_v21  ;;  %1538 = vset.pattern.permute.xlu0 %v1576_v24  ;;  %1537 = vset.pattern.permute.xlu1 %v1576_v24  ;;  %v734_v24 = vld [vmem:[%s2203_s3 + $0x78] sm:$0xff] }
 0x1fe   :  { %v1430_v19 = vpack.c.bf16 %v694_v56, %v692_v47  ;;  %v619_v49 = vadd.f32 %v618_v39, %v480_v21  ;;  %1131 = vperm.xlu1 %1537, %v1544_v52  }
 0x1ff   :  { %v695_v22 = vmax.f32 %v617_v60, 0.0 }
 0x200   :  { %v622_v20 = vpop.f32.mrb[10].mxu0  ;;  %1431 = vmatprep.subr.bf16.mxu1 %v1430_v19  ;;  %v696_v35 = vmax.f32 %v619_v49, 0.0 }
 0x201   :  { %v623_v32 = vadd.f32 %v622_v20, %v484_v48  ;;  %v624_v9 = vpop.f32.mrb[11].mxu0  ;;  %1433 = vmatpush1.bf16.msra.mxu1 %v1432_v14  ;;  %v512_v20 = vpop.permute.xlu1 %511 }
 0x202   :  { %v625_v33 = vadd.f32 %v624_v9, %v484_v48 }
 0x203   :  { %v697_v34 = vmax.f32 %v623_v32, 0.0 }
 0x204   :  { %v698_v37 = vmax.f32 %v625_v33, 0.0  ;;  %v628_v57 = vpop.f32.mrb[12].mxu0  ;;  %v516_v33 = vpop.permute.xlu0 %515 }
 0x205   :  { %v1436_v15 = vpack.c.bf16 %v697_v34, %v695_v22  ;;  %v630_v23 = vpop.f32.mrb[13].mxu0  ;;  %v629_v50 = vadd.f32 %v628_v57, %v488_v40 }
 0x206   :  { %v1434_v25 = vpack.c.bf16 %v698_v37, %v696_v35  ;;  %v631_v41 = vadd.f32 %v630_v23, %v488_v40 }
 0x207   :  { %v699_v54 = vmax.f32 %v629_v50, 0.0 }
 0x208   :  { %v634_v42 = vpop.f32.mrb[14].mxu0  ;;  %1435 = vmatprep.subr.bf16.mxu1 %v1434_v25  ;;  %v700_v0 = vmax.f32 %v631_v41, 0.0 }
 0x209   :  { %v635_v26 = vadd.f32 %v634_v42, %v492_v28  ;;  %v636_v11 = vpop.f32.mrb[15].mxu0  ;;  %1437 = vmatpush1.bf16.msra.mxu1 %v1436_v15  ;;  %v520_v42 = vpop.permute.xlu1 %519 }
 0x20a   :  { %v637_v53 = vadd.f32 %v636_v11, %v492_v28 }
 0x20b   :  { %v701_v55 = vmax.f32 %v635_v26, 0.0 }
 0x20c   :  { %v702_v51 = vmax.f32 %v637_v53, 0.0  ;;  %v640_v3 = vpop.f32.mrb[16].mxu0  ;;  %v524_v53 = vpop.permute.xlu0 %523 }
 0x20d   :  { %v1440_v16 = vpack.c.bf16 %v701_v55, %v699_v54  ;;  %v642_v4 = vpop.f32.mrb[17].mxu0  ;;  %v641_v38 = vadd.f32 %v640_v3, %v496_v43 }
 0x20e   :  { %v1438_v5 = vpack.c.bf16 %v702_v51, %v700_v0  ;;  %v643_v6 = vadd.f32 %v642_v4, %v496_v43 }
 0x20f   :  { %v703_v61 = vmax.f32 %v641_v38, 0.0 }
 0x210   :  { %v646_v2 = vpop.f32.mrb[18].mxu0  ;;  %1439 = vmatprep.subr.bf16.mxu1 %v1438_v5  ;;  %v704_v10 = vmax.f32 %v643_v6, 0.0  ;;  %v719_v6 = vld [vmem:[%s2203_s3] sm:$0xff] }
 0x211   :  { %v647_v30 = vadd.f32 %v646_v2, %v500_v27  ;;  %v648_v12 = vpop.f32.mrb[19].mxu0  ;;  %1441 = vmatpush1.bf16.msra.mxu1 %v1440_v16  ;;  %v720_v2 = vld [vmem:[%s2203_s3 + $0x8] sm:$0xff] }
 0x212   :  { %v649_v45 = vadd.f32 %v648_v12, %v500_v27  ;;  %v722_v12 = vld [vmem:[%s2203_s3 + $0x18] sm:$0xff] }
 0x213   :  { %v705_v31 = vmax.f32 %v647_v30, 0.0  ;;  %v721_v30 = vld [vmem:[%s2203_s3 + $0x10] sm:$0xff] }
 0x214   :  { %v706_v44 = vmax.f32 %v649_v45, 0.0  ;;  %v652_v58 = vpop.f32.mrb[20].mxu0  ;;  %v723_v45 = vld [vmem:[%s2203_s3 + $0x20] sm:$0xff] }
 0x215   :  { %v1444_v17 = vpack.c.bf16 %v705_v31, %v703_v61  ;;  %v654_v59 = vpop.f32.mrb[21].mxu0  ;;  %v653_v8 = vadd.f32 %v652_v58, %v504_v62  ;;  %v724_v61 = vld [vmem:[%s2203_s3 + $0x28] sm:$0xff]  ;;  %v725_v31 = vld [vmem:[%s2203_s3 + $0x30] sm:$0xff] }
 0x216   :  { %v1442_v1 = vpack.c.bf16 %v706_v44, %v704_v10  ;;  %v655_v63 = vadd.f32 %v654_v59, %v504_v62  ;;  %v726_v10 = vld [vmem:[%s2203_s3 + $0x38] sm:$0xff]  ;;  %v727_v44 = vld [vmem:[%s2203_s3 + $0x40] sm:$0xff]  ;;  %v728_v58 = vld [vmem:[%s2203_s3 + $0x48] sm:$0xff] }
 0x217   :  { %v707_v14 = vmax.f32 %v653_v8, 0.0  ;;  %v730_v59 = vld [vmem:[%s2203_s3 + $0x58] sm:$0xff]  ;;  %v731_v62 = vld [vmem:[%s2203_s3 + $0x60] sm:$0xff]  ;;  %v733_v8 = vld [vmem:[%s2203_s3 + $0x70] sm:$0xff] }
 0x218   :  { %v658_v46 = vpop.f32.mrb[22].mxu0  ;;  %1443 = vmatprep.subr.bf16.mxu1 %v1442_v1  ;;  %v708_v21 = vmax.f32 %v655_v63, 0.0  ;;  %v732_v1 = vld [vmem:[%s2203_s3 + $0x68] sm:$0xff] }
 0x219   :  { %v659_v47 = vadd.f32 %v658_v46, %v508_v13  ;;  %v660_v56 = vpop.f32.mrb[23].mxu0  ;;  %1445 = vmatpush1.bf16.msra.mxu1 %v1444_v17  ;;  %v729_v17 = vld [vmem:[%s2203_s3 + $0x50] sm:$0xff]  ;;  %v1153_v63 = vld [vmem:[%s2204_s4 + $0x88] sm:$0xff] }
 0x21a   :  { %v661_v7 = vadd.f32 %v660_v56, %v508_v13  ;;  %v1152_v13 = vld [vmem:[%s2204_s4 + $0x80] sm:$0xff]  ;;  %v1137_v56 = vld [vmem:[%s2204_s4 + $0x8] sm:$0xff] }
 0x21b   :  { %v709_v39 = vmax.f32 %v659_v47, 0.0  ;;  %v1458_v46 = vpack.c.bf16 %v1153_v63, %v1152_v13  ;;  %v1136_v47 = vld [vmem:[%s2204_s4] sm:$0xff] }
 0x21c   :  { %v710_v19 = vmax.f32 %v661_v7, 0.0  ;;  %v664_v60 = vpop.f32.mrb[24].mxu0  ;;  %v1460_v18 = vpack.c.bf16 %v1137_v56, %v1136_v47  ;;  %v1155_v7 = vld [vmem:[%s2204_s4 + $0x98] sm:$0xff] }
 0x21d   :  { %v1448_v48 = vpack.c.bf16 %v709_v39, %v707_v14  ;;  %v666_v49 = vpop.f32.mrb[25].mxu0  ;;  %v665_v9 = vadd.f32 %v664_v60, %v512_v20  ;;  %1459 = vmatprep.subr.bf16.mxu0 %v1458_v46  ;;  %v1138_v39 = vld [vmem:[%s2204_s4 + $0x10] sm:$0xff]  ;;  %v1156_v60 = vld [vmem:[%s2204_s4 + $0xa0] sm:$0xff] }
 0x21e   :  { %v1446_v32 = vpack.c.bf16 %v710_v19, %v708_v21  ;;  %v667_v22 = vadd.f32 %v666_v49, %v512_v20  ;;  %1461 = vmatpush3.bf16.msra.mxu0 %v1460_v18  ;;  %v1139_v21 = vld [vmem:[%s2204_s4 + $0x18] sm:$0xff]  ;;  %v1140_v20 = vld [vmem:[%s2204_s4 + $0x20] sm:$0xff] }
 0x21f   :  { %v711_v15 = vmax.f32 %v665_v9, 0.0  ;;  %v1464_v19 = vpack.c.bf16 %v1139_v21, %v1138_v39  ;;  %v1158_v9 = vld [vmem:[%s2204_s4 + $0xb0] sm:$0xff] }
 0x220   :  { %v670_v34 = vpop.f32.mrb[26].mxu0  ;;  %1447 = vmatprep.subr.bf16.mxu1 %v1446_v32  ;;  %v712_v40 = vmax.f32 %v667_v22, 0.0  ;;  %v1141_v32 = vld [vmem:[%s2204_s4 + $0x28] sm:$0xff] }
 0x221   :  { %v671_v35 = vadd.f32 %v670_v34, %v516_v33  ;;  %v672_v37 = vpop.f32.mrb[27].mxu0  ;;  %1449 = vmatpush1.bf16.msra.mxu1 %v1448_v48  ;;  %v1157_v48 = vld [vmem:[%s2204_s4 + $0xa8] sm:$0xff]  ;;  %v1468_v52 = vpack.c.bf16 %v1141_v32, %v1140_v20  ;;  %v1142_v34 = vld [vmem:[%s2204_s4 + $0x30] sm:$0xff] }
 0x222   :  { %v673_v57 = vadd.f32 %v672_v37, %v516_v33  ;;  %v1466_v49 = vpack.c.bf16 %v1157_v48, %v1156_v60  ;;  %v1159_v33 = vld [vmem:[%s2204_s4 + $0xb8] sm:$0xff] }
 0x223   :  { %v713_v23 = vmax.f32 %v671_v35, 0.0  ;;  %v1470_v22 = vpack.c.bf16 %v1159_v33, %v1158_v9  ;;  %v1143_v35 = vld [vmem:[%s2204_s4 + $0x38] sm:$0xff] }
 0x224   :  { %v714_v25 = vmax.f32 %v673_v57, 0.0  ;;  %v676_v50 = vpop.f32.mrb[28].mxu0  ;;  %v1472_v37 = vpack.c.bf16 %v1143_v35, %v1142_v34  ;;  %v1160_v57 = vld [vmem:[%s2204_s4 + $0xc0] sm:$0xff] }
 0x225   :  { %v1452_v28 = vpack.c.bf16 %v713_v23, %v711_v15  ;;  %v678_v41 = vpop.f32.mrb[29].mxu0  ;;  %v677_v11 = vadd.f32 %v676_v50, %v520_v42  ;;  %v1161_v15 = vld [vmem:[%s2204_s4 + $0xc8] sm:$0xff] }
 0x226   :  { %v1450_v26 = vpack.c.bf16 %v714_v25, %v712_v40  ;;  %v679_v54 = vadd.f32 %v678_v41, %v520_v42  ;;  %v1474_v23 = vpack.c.bf16 %v1161_v15, %v1160_v57  ;;  %v1144_v40 = vld [vmem:[%s2204_s4 + $0x40] sm:$0xff]  ;;  %v1145_v25 = vld [vmem:[%s2204_s4 + $0x48] sm:$0xff]  ;;  %v1163_v41 = vld [vmem:[%s2204_s4 + $0xd8] sm:$0xff] }
 0x227   :  { %v715_v16 = vmax.f32 %v677_v11, 0.0  ;;  %v1476_v50 = vpack.c.bf16 %v1145_v25, %v1144_v40  ;;  %v1147_v11 = vld [vmem:[%s2204_s4 + $0x58] sm:$0xff] }
 0x228   :  { %v682_v55 = vpop.f32.mrb[30].mxu0  ;;  %1451 = vmatprep.subr.bf16.mxu1 %v1450_v26  ;;  %v716_v43 = vmax.f32 %v679_v54, 0.0  ;;  %v1146_v26 = vld [vmem:[%s2204_s4 + $0x50] sm:$0xff] }
 0x229   :  { %v683_v0 = vadd.f32 %v682_v55, %v524_v53  ;;  %v684_v51 = vpop.f32.mrb[31].mxu0  ;;  %1453 = vmatpush1.bf16.msra.mxu1 %v1452_v28  ;;  %v1162_v28 = vld [vmem:[%s2204_s4 + $0xd0] sm:$0xff]  ;;  %v1480_v54 = vpack.c.bf16 %v1147_v11, %v1146_v26  ;;  %v1165_v55 = vld [vmem:[%s2204_s4 + $0xe8] sm:$0xff] }
 0x22a   :  { %v685_v3 = vadd.f32 %v684_v51, %v524_v53  ;;  %v1478_v42 = vpack.c.bf16 %v1163_v41, %v1162_v28  ;;  %v1164_v53 = vld [vmem:[%s2204_s4 + $0xe0] sm:$0xff]  ;;  %v1149_v51 = vld [vmem:[%s2204_s4 + $0x68] sm:$0xff] }
 0x22b   :  { %v717_v4 = vmax.f32 %v683_v0, 0.0  ;;  %v1148_v0 = vld [vmem:[%s2204_s4 + $0x60] sm:$0xff] }
 0x22c   :  { %v718_v5 = vmax.f32 %v685_v3, 0.0  ;;  %v1482_v3 = vpack.c.bf16 %v1165_v55, %v1164_v53 }
 0x22d   :  { %v1456_v38 = vpack.c.bf16 %v717_v4, %v715_v16  ;;  %v1166_v16 = vld [vmem:[%s2204_s4 + $0xf0] sm:$0xff]  ;;  %v1167_v4 = vld [vmem:[%s2204_s4 + $0xf8] sm:$0xff] }
 0x22e   :  { %v1454_v27 = vpack.c.bf16 %v718_v5, %v716_v43  ;;  %v1484_v43 = vpack.c.bf16 %v1149_v51, %v1148_v0  ;;  %v1486_v5 = vpack.c.bf16 %v1167_v4, %v1166_v16 }
 0x230   :  { %1455 = vmatprep.subr.bf16.mxu1 %v1454_v27  ;;  %v1151_v27 = vld [vmem:[%s2204_s4 + $0x78] sm:$0xff] }
 0x231   :  { %1457 = vmatpush1.bf16.msra.mxu1 %v1456_v38  ;;  %v1150_v38 = vld [vmem:[%s2204_s4 + $0x70] sm:$0xff] }
 0x234   :  { %864 = vmatmul.mubr.f32.vlgmr.msra.gmra.mrb[0].mxu1 %v719_v6  ;;  %v1488_v6 = vpack.c.bf16 %v1151_v27, %v1150_v38 }
 0x235   :  { %869 = vmatprep.mubr.f32.mxu1 %v1572_v36 }
 0x238   :  { %870 = vmatmul.mubr.f32.gmra.mrb[2].mxu1 %v720_v2  ;;  %v1239_v2 = vld [vmem:[%s2205_s5 + $0x8] sm:$0xff] }
 0x239   :  { %875 = vmatprep.mubr.f32.mxu1 %v1572_v36 }
 0x23c   :  { %876 = vmatmul.mubr.f32.gmra.mrb[4].mxu1 %v721_v30  ;;  %v1241_v30 = vld [vmem:[%s2205_s5 + $0x18] sm:$0xff] }
 0x23d   :  { %881 = vmatprep.mubr.f32.mxu1 %v1572_v36 }
 0x240   :  { %882 = vmatmul.mubr.f32.gmra.mrb[6].mxu1 %v722_v12  ;;  %v1238_v12 = vld [vmem:[%s2205_s5] sm:$0xff] }
 0x241   :  { %887 = vmatprep.mubr.f32.mxu1 %v1572_v36 }
 0x244   :  { %888 = vmatmul.mubr.f32.gmra.mrb[8].mxu1 %v723_v45  ;;  %v1490_v45 = vpack.c.bf16 %v1241_v30, %v1239_v2 }
 0x245   :  { %893 = vmatprep.mubr.f32.mxu1 %v1572_v36 }
 0x246   :  { %1491 = vmatprep.subr.bf16.mxu1 %v1490_v45 }
 0x248   :  { %894 = vmatmul.mubr.f32.gmra.mrb[10].mxu1 %v724_v61  ;;  %v1240_v61 = vld [vmem:[%s2205_s5 + $0x10] sm:$0xff] }
 0x249   :  { %899 = vmatprep.mubr.f32.mxu1 %v1572_v36 }
 0x24c   :  { %900 = vmatmul.mubr.f32.gmra.mrb[12].mxu1 %v725_v31  ;;  %v1492_v31 = vpack.c.bf16 %v1240_v61, %v1238_v12 }
 0x24d   :  { %905 = vmatprep.mubr.f32.mxu1 %v1572_v36 }
 0x24e   :  { %1493 = vmatpush1.bf16.msra.mxu1 %v1492_v31 }
 0x250   :  { %906 = vmatmul.mubr.f32.gmra.mrb[14].mxu1 %v726_v10  ;;  %v737_v10 = vpop.permute.xlu1 %736 }
 0x251   :  { %911 = vmatprep.mubr.f32.mxu1 %v1572_v36 }
 0x254   :  { %912 = vmatmul.mubr.f32.gmra.mrb[16].mxu1 %v727_v44  ;;  %v745_v44 = vpop.permute.xlu1 %744 }
 0x255   :  { %917 = vmatprep.mubr.f32.mxu1 %v1572_v36 }
 0x258   :  { %918 = vmatmul.mubr.f32.gmra.mrb[18].mxu1 %v728_v58  ;;  %v749_v58 = vpop.permute.xlu1 %748 }
 0x259   :  { %923 = vmatprep.mubr.f32.mxu1 %v1572_v36 }
 0x25c   :  { %924 = vmatmul.mubr.f32.gmra.mrb[20].mxu1 %v729_v17  ;;  %v741_v17 = vpop.permute.xlu0 %740 }
 0x25d   :  { %929 = vmatprep.mubr.f32.mxu1 %v1572_v36 }
 0x260   :  { %930 = vmatmul.mubr.f32.gmra.mrb[22].mxu1 %v730_v59  ;;  %v998_v59 = vpop.permute.xlu1 %997 }
 0x261   :  { %935 = vmatprep.mubr.f32.mxu1 %v1572_v36 }
 0x264   :  { %936 = vmatmul.mubr.f32.gmra.mrb[24].mxu1 %v731_v62  ;;  %v994_v62 = vpop.permute.xlu0 %993 }
 0x265   :  { %941 = vmatprep.mubr.f32.mxu1 %v1572_v36 }
 0x268   :  { %942 = vmatmul.mubr.f32.gmra.mrb[26].mxu1 %v732_v1  ;;  %v753_v1 = vpop.permute.xlu1 %752 }
 0x269   :  { %947 = vmatprep.mubr.f32.mxu1 %v1572_v36 }
 0x26c   :  { %948 = vmatmul.mubr.f32.gmra.mrb[28].mxu1 %v733_v8  ;;  %v1002_v8 = vpop.permute.xlu0 %1001 }
 0x26d   :  { %953 = vmatprep.mubr.f32.mxu1 %v1572_v36 }
 0x270   :  { %954 = vmatmul.mubr.f32.gmra.mrb[30].mxu1 %v734_v24  ;;  %v757_v24 = vpop.permute.xlu1 %756  ;;  %v1006_v13 = vpop.permute.xlu0 %1005 }
 0x271   :  { %1310 = vmatprep.mubr.f32.mxu1 %v1572_v36  ;;  %v1154_v36 = vld [vmem:[%s2204_s4 + $0x90] sm:$0xff]  ;;  %s1578_s4 = smov [#allocation2]  }
 0x272   :  { %v1462_v14 = vpack.c.bf16 %v1155_v7, %v1154_v36  ;;  %s1350_s5 = sshll.u32 %s1578_s4, 4  ;;  %s1351_s5 = int_to_ptr.vmem [resolvable:$true] %s1350_s5 }
 0x273   :  { %s1545_s10 = scalar_lea.vmem %s1351_s5, 32  ;;  %p1550_p1 = scmp.lt.s32.totalorder %s1351_s5, %s1351_s5 }
 0x274   :  { %1463 = vmatprep.subr.bf16.mxu0 %v1462_v14  ;;  %v2174_v63 = vpop.permute.xlu1 %760  ;;  %v1010_v18 = vpop.permute.xlu0 %1009  ;;  %p1546_p0 = scmp.ne.s32.totalorder %s1351_s5, %s1545_s10  ;;  %p1551_p2 = scmp.lt.s32.totalorder %s1545_s10, %s1545_s10 }
 0x275   :  { %1465 = vmatpush3.bf16.msra.mxu0 %v1464_v19 }
 0x276   :  { %1467 = vmatprep.subr.bf16.mxu0 %v1466_v49  ;;  %p1552_p3 = por %p1551_p2, %p1550_p1 }
 0x278   :  { %v2176_v19 = vpop.permute.xlu1 %764  ;;  %v1014_v20 = vpop.permute.xlu0 %1013  ;;  %p1553_p4 = pnand %p1552_p3, %p1546_p0 }
 0x279   :  { %1469 = vmatpush3.bf16.msra.mxu0 %v1468_v52 }
 0x27a   :  { %1471 = vmatprep.subr.bf16.mxu0 %v1470_v22 }
 0x27c   :  { %v2178_v40 = vpop.permute.xlu1 %768  ;;  %v1018_v11 = vpop.permute.xlu0 %1017 }
 0x27d   :  { %1473 = vmatpush3.bf16.msra.mxu0 %v1472_v37 }
 0x27e   :  { %1475 = vmatprep.subr.bf16.mxu0 %v1474_v23 }
 0x280   :  { %v773_v38 = vpop.permute.xlu1 %772  ;;  %v1022_v12 = vpop.permute.xlu0 %1021 }
 0x281   :  { %1477 = vmatpush3.bf16.msra.mxu0 %v1476_v50 }
 0x282   :  { %1479 = vmatprep.subr.bf16.mxu0 %v1478_v42 }
 0x285   :  { %1481 = vmatpush3.bf16.msra.mxu0 %v1480_v54 }
 0x286   :  { %1483 = vmatprep.subr.bf16.mxu0 %v1482_v3 }
 0x289   :  { %1485 = vmatpush3.bf16.msra.mxu0 %v1484_v43 }
 0x28a   :  { %1487 = vmatprep.subr.bf16.mxu0 %v1486_v5 }
 0x28d   :  { %1489 = vmatpush3.bf16.msra.mxu0 %v1488_v6 }
 0x307   :  { %v865_v46 = vpop.f32.mrb[0].mxu1 }
 0x308   :  { %v866_v47 = vadd.f32 %v865_v46, %v737_v10  ;;  %v867_v56 = vpop.f32.mrb[1].mxu1  ;;  %v777_v46 = vpop.permute.xlu1 %776 }
 0x309   :  { %v868_v36 = vadd.f32 %v867_v56, %v737_v10 }
 0x30a   :  { %v960_v14 = vmax.f32 %v866_v47, 0.0 }
 0x30b   :  { %v871_v7 = vpop.f32.mrb[2].mxu1  ;;  %v961_v60 = vmax.f32 %v868_v36, 0.0 }
 0x30c   :  { %v872_v39 = vadd.f32 %v871_v7, %v741_v17  ;;  %v873_v21 = vpop.f32.mrb[3].mxu1  ;;  %v1056_v9 = vmul.f32 %v994_v62, %v960_v14  ;;  %v1026_v14 = vpop.permute.xlu0 %1025 }
 0x30d   :  { %v874_v48 = vadd.f32 %v873_v21, %v741_v17  ;;  %v1057_v35 = vmul.f32 %v994_v62, %v961_v60 }
 0x30e   :  { %v962_v49 = vmax.f32 %v872_v39, 0.0 }
 0x30f   :  { %v963_v32 = vmax.f32 %v874_v48, 0.0  ;;  %v877_v52 = vpop.f32.mrb[4].mxu1 }
 0x310   :  { %v1058_v33 = vmul.f32 %v998_v59, %v962_v49  ;;  %v878_v22 = vadd.f32 %v877_v52, %v745_v44  ;;  %v879_v34 = vpop.f32.mrb[5].mxu1 }
 0x311   :  { %v1059_v37 = vmul.f32 %v998_v59, %v963_v32  ;;  %v880_v57 = vadd.f32 %v879_v34, %v745_v44 }
 0x312   :  { %v1088_v15 = vadd.f32 %v1058_v33, %v1056_v9  ;;  %v964_v23 = vmax.f32 %v878_v22, 0.0  ;;  %v781_v33 = vpop.permute.xlu1 %780 }
 0x313   :  { %v1109_v25 = vadd.f32 %v1059_v37, %v1057_v35  ;;  %v965_v50 = vmax.f32 %v880_v57, 0.0  ;;  %v883_v28 = vpop.f32.mrb[6].mxu1  ;;  %v1030_v57 = vpop.permute.xlu0 %1029 }
 0x314   :  { %v1060_v41 = vmul.f32 %v1002_v8, %v964_v23  ;;  %v884_v42 = vadd.f32 %v883_v28, %v749_v58  ;;  %v885_v26 = vpop.f32.mrb[7].mxu1 }
 0x315   :  { %v1061_v53 = vmul.f32 %v1002_v8, %v965_v50  ;;  %v886_v54 = vadd.f32 %v885_v26, %v749_v58 }
 0x316   :  { %v1089_v55 = vadd.f32 %v1088_v15, %v1060_v41  ;;  %v966_v0 = vmax.f32 %v884_v42, 0.0 }
 0x317   :  { %v1110_v51 = vadd.f32 %v1109_v25, %v1061_v53  ;;  %v967_v3 = vmax.f32 %v886_v54, 0.0  ;;  %v889_v16 = vpop.f32.mrb[8].mxu1  ;;  %v785_v53 = vpop.permute.xlu1 %784 }
 0x318   :  { %v1062_v4 = vmul.f32 %v1006_v13, %v966_v0  ;;  %v890_v43 = vadd.f32 %v889_v16, %v753_v1  ;;  %v891_v5 = vpop.f32.mrb[9].mxu1 }
 0x319   :  { %v1063_v27 = vmul.f32 %v1006_v13, %v967_v3  ;;  %v892_v6 = vadd.f32 %v891_v5, %v753_v1  ;;  %v1034_v3 = vpop.permute.xlu0 %1033 }
 0x31a   :  { %v1090_v2 = vadd.f32 %v1089_v55, %v1062_v4  ;;  %v968_v30 = vmax.f32 %v890_v43, 0.0 }
 0x31b   :  { %v1111_v45 = vadd.f32 %v1110_v51, %v1063_v27  ;;  %v969_v61 = vmax.f32 %v892_v6, 0.0  ;;  %v895_v31 = vpop.f32.mrb[10].mxu1 }
 0x31c   :  { %v1064_v10 = vmul.f32 %v1010_v18, %v968_v30  ;;  %v896_v44 = vadd.f32 %v895_v31, %v757_v24  ;;  %v897_v58 = vpop.f32.mrb[11].mxu1 }
 0x31d   :  { %v1065_v17 = vmul.f32 %v1010_v18, %v969_v61  ;;  %v898_v59 = vadd.f32 %v897_v58, %v757_v24  ;;  %v1038_v58 = vpop.permute.xlu0 %1037 }
 0x31e   :  { %v1091_v62 = vadd.f32 %v1090_v2, %v1064_v10  ;;  %v970_v8 = vmax.f32 %v896_v44, 0.0 }
 0x31f   :  { %v1112_v47 = vadd.f32 %v1111_v45, %v1065_v17  ;;  %v971_v56 = vmax.f32 %v898_v59, 0.0  ;;  %v901_v36 = vpop.f32.mrb[12].mxu1  ;;  %v789_v45 = vpop.permute.xlu1 %788 }
 0x320   :  { %v1066_v7 = vmul.f32 %v1014_v20, %v970_v8  ;;  %v902_v1 = vadd.f32 %v901_v36, %v2174_v63  ;;  %v903_v13 = vpop.f32.mrb[13].mxu1 }
 0x321   :  { %v1067_v39 = vmul.f32 %v1014_v20, %v971_v56  ;;  %v904_v21 = vadd.f32 %v903_v13, %v2174_v63 }
 0x322   :  { %v1092_v60 = vadd.f32 %v1091_v62, %v1066_v7  ;;  %v972_v48 = vmax.f32 %v902_v1, 0.0 }
 0x323   :  { %v1113_v49 = vadd.f32 %v1112_v47, %v1067_v39  ;;  %v973_v32 = vmax.f32 %v904_v21, 0.0  ;;  %v907_v18 = vpop.f32.mrb[14].mxu1  ;;  %v793_v13 = vpop.permute.xlu1 %792 }
 0x324   :  { %v1068_v24 = vmul.f32 %v1018_v11, %v972_v48  ;;  %v908_v52 = vadd.f32 %v907_v18, %v2176_v19  ;;  %v909_v9 = vpop.f32.mrb[15].mxu1 }
 0x325   :  { %v1069_v22 = vmul.f32 %v1018_v11, %v973_v32  ;;  %v910_v34 = vadd.f32 %v909_v9, %v2176_v19 }
 0x326   :  { %v1093_v35 = vadd.f32 %v1092_v60, %v1068_v24  ;;  %v974_v37 = vmax.f32 %v908_v52, 0.0 }
 0x327   :  { %v1114_v15 = vadd.f32 %v1113_v49, %v1069_v22  ;;  %v975_v20 = vmax.f32 %v910_v34, 0.0  ;;  %v913_v23 = vpop.f32.mrb[16].mxu1  ;;  %v1042_v49 = vpop.permute.xlu0 %1041 }
 0x328   :  { %v1070_v63 = vmul.f32 %v1022_v12, %v974_v37  ;;  %v914_v25 = vadd.f32 %v913_v23, %v2178_v40  ;;  %v915_v50 = vpop.f32.mrb[17].mxu1 }
 0x329   :  { %v1071_v28 = vmul.f32 %v1022_v12, %v975_v20  ;;  %v916_v41 = vadd.f32 %v915_v50, %v2178_v40 }
 0x32a   :  { %v1094_v42 = vadd.f32 %v1093_v35, %v1070_v63  ;;  %v976_v26 = vmax.f32 %v914_v25, 0.0 }
 0x32b   :  { %v1115_v54 = vadd.f32 %v1114_v15, %v1071_v28  ;;  %v977_v11 = vmax.f32 %v916_v41, 0.0  ;;  %v919_v55 = vpop.f32.mrb[18].mxu1  ;;  %v1046_v25 = vpop.permute.xlu0 %1045 }
 0x32c   :  { %v1072_v19 = vmul.f32 %v1026_v14, %v976_v26  ;;  %v920_v0 = vadd.f32 %v919_v55, %v773_v38  ;;  %v921_v51 = vpop.f32.mrb[19].mxu1 }
 0x32d   :  { %v1073_v16 = vmul.f32 %v1026_v14, %v977_v11  ;;  %v922_v4 = vadd.f32 %v921_v51, %v773_v38 }
 0x32e   :  { %v1095_v43 = vadd.f32 %v1094_v42, %v1072_v19  ;;  %v978_v5 = vmax.f32 %v920_v0, 0.0 }
 0x32f   :  { %v1116_v27 = vadd.f32 %v1115_v54, %v1073_v16  ;;  %v979_v6 = vmax.f32 %v922_v4, 0.0  ;;  %v925_v2 = vpop.f32.mrb[20].mxu1 }
 0x330   :  { %v1074_v30 = vmul.f32 %v1030_v57, %v978_v5  ;;  %v926_v12 = vadd.f32 %v925_v2, %v777_v46  ;;  %v927_v40 = vpop.f32.mrb[21].mxu1 }
 0x331   :  { %v1075_v61 = vmul.f32 %v1030_v57, %v979_v6  ;;  %v928_v31 = vadd.f32 %v927_v40, %v777_v46  ;;  %v797_v57 = vpop.permute.xlu1 %796 }
 0x332   :  { %v1096_v10 = vadd.f32 %v1095_v43, %v1074_v30  ;;  %v980_v44 = vmax.f32 %v926_v12, 0.0  ;;  %v1054_v12 = vpop.permute.xlu0 %1053 }
 0x333   :  { %v1117_v17 = vadd.f32 %v1116_v27, %v1075_v61  ;;  %v981_v59 = vmax.f32 %v928_v31, 0.0  ;;  %v931_v62 = vpop.f32.mrb[22].mxu1 }
 0x334   :  { %v1076_v8 = vmul.f32 %v1034_v3, %v980_v44  ;;  %v932_v47 = vadd.f32 %v931_v62, %v781_v33  ;;  %v933_v38 = vpop.f32.mrb[23].mxu1 }
 0x335   :  { %v1077_v56 = vmul.f32 %v1034_v3, %v981_v59  ;;  %v934_v36 = vadd.f32 %v933_v38, %v781_v33  ;;  %v1050_v55 = vpop.permute.xlu1 %1049 }
 0x336   :  { %v1097_v7 = vadd.f32 %v1096_v10, %v1076_v8  ;;  %v982_v1 = vmax.f32 %v932_v47, 0.0 }
 0x337   :  { %v1118_v14 = vadd.f32 %v1117_v17, %v1077_v56  ;;  %v983_v39 = vmax.f32 %v934_v36, 0.0  ;;  %v937_v21 = vpop.f32.mrb[24].mxu1 }
 0x338   :  { %v1078_v60 = vmul.f32 %v1038_v58, %v982_v1  ;;  %v938_v48 = vadd.f32 %v937_v21, %v785_v53  ;;  %v939_v46 = vpop.f32.mrb[25].mxu1 }
 0x339   :  { %v1079_v32 = vmul.f32 %v1038_v58, %v983_v39  ;;  %v940_v18 = vadd.f32 %v939_v46, %v785_v53  ;;  %v1132_v1 = vpop.permute.xlu1 %1131 }
 0x33a   :  { %v1098_v24 = vadd.f32 %v1097_v7, %v1078_v60  ;;  %v984_v52 = vmax.f32 %v938_v48, 0.0 }
 0x33b   :  { %v1119_v9 = vadd.f32 %v1118_v14, %v1079_v32  ;;  %v985_v22 = vmax.f32 %v940_v18, 0.0  ;;  %v943_v34 = vpop.f32.mrb[26].mxu1  ;;  %v1577_v18 = vmov 1966171168  }
 0x33c   :  { %v1080_v35 = vmul.f32 %v1042_v49, %v984_v52  ;;  %v944_v37 = vadd.f32 %v943_v34, %v789_v45  ;;  %v945_v33 = vpop.f32.mrb[27].mxu1 }
 0x33d   :  { %v1081_v15 = vmul.f32 %v1042_v49, %v985_v22  ;;  %v946_v20 = vadd.f32 %v945_v33, %v789_v45 }
 0x33e   :  { %v1099_v23 = vadd.f32 %v1098_v24, %v1080_v35  ;;  %v986_v63 = vmax.f32 %v944_v37, 0.0  ;;  %v1325_v24 = vunpack.c.l.s4 %v1577_v18 }
 0x33f   :  { %v1120_v50 = vadd.f32 %v1119_v9, %v1081_v15  ;;  %v987_v28 = vmax.f32 %v946_v20, 0.0  ;;  %v949_v41 = vpop.f32.mrb[28].mxu1  ;;  %v2208_v15 = vlaneseq }
 0x340   :  { %v1082_v42 = vmul.f32 %v1046_v25, %v986_v63  ;;  %v950_v26 = vadd.f32 %v949_v41, %v793_v13  ;;  %v951_v53 = vpop.f32.mrb[29].mxu1  ;;  %v1326_v52 = vunpack.c.0.s8 %v1325_v24 }
 0x341   :  { %v1083_v54 = vmul.f32 %v1046_v25, %v987_v28  ;;  %v952_v11 = vadd.f32 %v951_v53, %v793_v13  ;;  %vm1341_vm1 = vcmp.lt.s32.totalorder %v2208_v15, 256 }
 0x342   :  { %v1100_v19 = vadd.f32 %v1099_v23, %v1082_v42  ;;  %v988_v0 = vmax.f32 %v950_v26, 0.0  ;;  %v1329_v37 = vsub.s32 %v1326_v52, %v1770_v29 }
 0x343   :  { %v1121_v51 = vadd.f32 %v1120_v50, %v1083_v54  ;;  %v989_v3 = vmax.f32 %v952_v11, 0.0  ;;  %v955_v16 = vpop.f32.mrb[30].mxu1 }
 0x344   :  { %v1084_v4 = vmul.f32 %v1050_v55, %v988_v0  ;;  %v956_v43 = vadd.f32 %v955_v16, %v797_v57  ;;  %v957_v5 = vpop.f32.mrb[31].mxu1 }
 0x345   :  { %v1085_v27 = vmul.f32 %v1050_v55, %v989_v3  ;;  %v958_v6 = vadd.f32 %v957_v5, %v797_v57 }
 0x346   :  { %v1101_v2 = vadd.f32 %v1100_v19, %v1084_v4  ;;  %v990_v30 = vmax.f32 %v956_v43, 0.0 }
 0x347   :  { %v1122_v40 = vadd.f32 %v1121_v51, %v1085_v27  ;;  %v991_v45 = vmax.f32 %v958_v6, 0.0 }
 0x348   :  { %v1086_v61 = vmul.f32 %v1054_v12, %v990_v30 }
 0x349   :  { %v1087_v31 = vmul.f32 %v1054_v12, %v991_v45 }
 0x34a   :  { %v1102_v10 = vadd.f32 %v1101_v2, %v1086_v61 }
 0x34b   :  { %v1123_v44 = vadd.f32 %v1122_v40, %v1087_v31 }
 0x34c   :  { %v1103_v58 = vrot.slane %v1102_v10, 4 }
 0x34d   :  { %v1124_v17 = vrot.slane %v1123_v44, 4 }
 0x34e   :  { %v1104_v59 = vadd.f32 %v1103_v58, %v1102_v10 }
 0x34f   :  { %v1125_v62 = vadd.f32 %v1124_v17, %v1123_v44 }
 0x350   :  { %v1105_v8 = vrot.slane %v1104_v59, 2 }
 0x351   :  { %v1126_v47 = vrot.slane %v1125_v62, 2 }
 0x352   :  { %v1106_v38 = vadd.f32 %v1105_v8, %v1104_v59 }
 0x353   :  { %v1127_v56 = vadd.f32 %v1126_v47, %v1125_v62 }
 0x354   :  { %v1107_v36 = vrot.slane %v1106_v38, 1 }
 0x355   :  { %v1128_v7 = vrot.slane %v1127_v56, 1 }
 0x356   :  { %v1108_v13 = vadd.f32 %v1107_v36, %v1106_v38 }
 0x357   :  { %v1129_v14 = vadd.f32 %v1128_v7, %v1127_v56 }
 0x358   :  { %v1134_v21 = vadd.f32 %v1132_v1, %v1108_v13 }
 0x359   :  { %v1135_v39 = vadd.f32 %v1132_v1, %v1129_v14 }
 0x35b   :  { %1232 = vmatprep.mubr.f32.mxu0 %v1135_v39 }
 0x35c   :  { %1233 = vmatmul.mubr.f32.vlgmr.msra.gmra.mrb[32].mxu0 %v1134_v21 }
 0x42f   :  { %v1391_v60 = vpop.f32.mrb[32].mxu0 }
 0x430   :  { %v1392_v48 = vpop.f32.mrb[33].mxu0 }
 0x431   :  { %v1393_v46 = vadd.f32 %v1392_v48, %v1391_v60 }
 0x433   :  { %1358 = vmatmul.mubr.msk.f32.vlgmr.msra.gmra.mrb[32].mxu1 %vm1242_vm0, %v1393_v46 }
 0x506   :  { %v1312_v49 = vpop.f32.mrb[32].mxu1 }
 0x507   :  { %1539 = vrcp.f32 %v1312_v49  ;;  %v1314_v32 = vpop.f32.mrb[33].mxu1 }
 0x508   :  { %1541 = vrcp.f32 %v1314_v32 }
 0x511   :  { %v1540_v9 = vpop.eup %1539 }
 0x512   :  { %v1542_v22 = vpop.eup %1541  ;;  %v1318_v34 = vmul.f32 %v1540_v9, %v1134_v21 }
 0x513   :  { %v1320_v35 = vmul.f32 %v1542_v22, %v1135_v39 }
 0x515   :  { %v1323_v33 = vcombine.low %v1318_v34, %v1320_v35 }
 0x517   :  { %v1330_v57 = vrot.slane %v1323_v33, %v1329_v37 }
 0x519   :  { %v1337_v20 = vrot.slane %v1330_v57, %v1329_v37 }
 0x51b   :  { %1343 = vst.msk [vmem:[#allocation2] sm:$0x3] %vm1341_vm1, %v1337_v20 }
 0x51c   :  { %1556 = shalt.err (!%p1553_p4)
}
 0x51d   :  { %s1557_s2 = scalar_lea.hbm %s2206_s6, 32 }
 0x51e   :  { %p1558_p5 = scmp.ne.s32.totalorder %s2206_s6, %s1557_s2  ;;  %p1561_p6 = scmp.lt.u32.totalorder %s1557_s2, %s2206_s6 }
 0x520   :  { %p1563_p7 = pnand %p1561_p6, %p1558_p5 }
 0x522   :  { %1566 = shalt.err (!%p1563_p7)
}
 0x523   :  { %1353 = dma.vmem_to_hbm [thread:$0]  %s1351_s5, 32, %s2206_s6, [#allocation3]  }
 0x524   :  { %1567 = dma.done.wait [#allocation3], 32  }
 0x525   :  { %1568 = vsyncadd [#allocation3], 4294967264 }
 0x526   :  { %1357 = vsyncpa [#allocation3], 1 }

</bundles_post_ra>
